<compile_context>
chip_gen: v5e
topology: v5e:2x2
jax: 0.10.0
libtpu: 0.0.40
codegen_flags: <defaults>
</compile_context>

<pallas_src>
import functools
import math

import jax
import jax.numpy as jnp
from jax.experimental import pallas as pl
from jax.experimental.pallas import tpu as pltpu


def _cdiv(a, b):
    return (a + b - 1) // b


def _round_up(x, m):
    return ((x + m - 1) // m) * m


def _vmem_capacity_bytes():
    """Physical VMEM per TensorCore (64 MiB on v7x, 128 MiB on v5e/v6e)."""
    try:
        cap = getattr(pltpu.get_tpu_info(), "vmem_capacity_bytes", None)
        if cap:
            return int(cap)
    except Exception:
        pass
    return 64 << 20  # conservative (v7x-sized) fallback


def _fourier_kernel_aligned(x_ref, bt_ref, o_ref, *, mapdim, indim):
    # mapdim % 128 == 0 path.
    # x_ref : (TN, indim)      input dtype
    # bt_ref: (indim, mapdim)  float32, already scaled by 2*pi
    # o_ref : (TN, 2*mapdim)   output dtype
    x = x_ref[...].astype(jnp.float32)
    bt = bt_ref[...]

    # VPU projection: xp[n, m] = sum_k x[n, k] * bt[k, m].  indim is tiny
    # (2-8 for PINN coordinates), so an unrolled broadcast multiply-add beats
    # pushing a 3-deep contraction through the MXU.
    xp = x[:, 0:1] * bt[0:1, :]
    for k in range(1, indim):
        xp = xp + x[:, k:k + 1] * bt[k:k + 1, :]

    # Two lane-dense unmasked half stores -> exact torch.cat([cos, sin], -1).
    o_ref[:, :mapdim] = jnp.cos(xp).astype(o_ref.dtype)
    o_ref[:, mapdim:] = jnp.sin(xp).astype(o_ref.dtype)


def _fourier_kernel_select(x_ref, bt2_ref, o_ref, *, mapdim, indim):
    # mapdim % 128 != 0 path.
    # bt2_ref: (indim, 2*mapdim) = [2*pi*B.T | 2*pi*B.T]  (duplicated in wrapper)
    # The full-width phase is computed once per output column, then cos/sin is
    # selected by lane index -> a single contiguous full-width store with only
    # the final boundary vreg masked; no wrapper concatenate, no in-kernel
    # lane shuffles.
    x = x_ref[...].astype(jnp.float32)
    bt2 = bt2_ref[...]

    xp = x[:, 0:1] * bt2[0:1, :]
    for k in range(1, indim):
        xp = xp + x[:, k:k + 1] * bt2[k:k + 1, :]

    col = jax.lax.broadcasted_iota(jnp.int32, xp.shape, 1)
    out = jnp.where(col < mapdim, jnp.cos(xp), jnp.sin(xp))
    o_ref[...] = out.astype(o_ref.dtype)


def fourier_features(x, B, *, out_dtype=None, target_tile_bytes=6 << 20):
    """Pallas TPU forward of FourierFeatures.

    x: [..., indim], B: [mapdim, indim].
    Returns concat([cos(2*pi*x@B.T), sin(2*pi*x@B.T)], -1) of shape [..., 2*mapdim].
    """
    orig_shape = x.shape
    mapdim, indim = B.shape
    assert orig_shape[-1] == indim, (orig_shape, B.shape)
    N = int(math.prod(orig_shape[:-1])) if len(orig_shape) > 1 else 1
    x2 = x.reshape(N, indim)

    out_dtype = jnp.dtype(out_dtype or x.dtype)
    out_itemsize = out_dtype.itemsize
    x_itemsize = jnp.dtype(x.dtype).itemsize
    outdim = 2 * mapdim

    # Fold the 2*pi scale into the (tiny, constant) projection matrix, in f32.
    bt = (2.0 * math.pi) * B.T.astype(jnp.float32)            # [indim, mapdim]

    aligned = (mapdim % 128 == 0)
    if aligned:
        bt_arg = bt                                            # (indim, mapdim)
        kernel = functools.partial(_fourier_kernel_aligned, mapdim=mapdim, indim=indim)
    else:
        bt_arg = jnp.concatenate([bt, bt], axis=1)             # (indim, 2*mapdim)
        kernel = functools.partial(_fourier_kernel_select, mapdim=mapdim, indim=indim)
    bt_cols = bt_arg.shape[1]

    # ---- Generation-aware VMEM budget ------------------------------------
    vmem_cap = _vmem_capacity_bytes()
    if vmem_cap <= (64 << 20):            # v7x: 64 MiB physical VMEM
        out_buf_cap = 10 << 20            # per output buffer (double-buffered)
        vmem_ceiling = 56 << 20           # leave headroom for compiler scratch
    else:                                 # v5e / v6e: 128 MiB physical VMEM
        out_buf_cap = 36 << 20
        vmem_ceiling = 100 << 20

    # ---- Row tiling --------------------------------------------------------
    # Target ~4-8 MiB output tiles (amortize ~0.35us/step pipeline overhead),
    # clamp to [512, 4096] rows, respect the per-buffer VMEM cap, multiple of 8.
    row_bytes = max(outdim * out_itemsize, 1)
    tn_target = target_tile_bytes // row_bytes
    tn_target = max(512, min(4096, tn_target))
    tn_target = min(tn_target, max(8, out_buf_cap // row_bytes))
    tn_target = max(8, (tn_target // 8) * 8)

    # Balanced tiles: pick the tile COUNT first, then the multiple-of-8 tile
    # size, so N just above a tile multiple pads <2% instead of ~a full tile.
    num_tiles = _cdiv(N, tn_target)
    if num_tiles == 1 and N > 8:
        num_tiles = 2                      # >=2 grid steps -> both v7x TCs busy
    if num_tiles > 1 and num_tiles % 2 == 1:
        num_tiles += 1                     # even step count balances the 2 TCs
    TN = max(8, _round_up(_cdiv(N, num_tiles), 8))
    grid = (_cdiv(N, TN),)                 # ragged last block handled by Pallas

    # Honest VMEM estimate: double-buffered x / out tiles + double-buffered Bt.
    vmem_needed = (2 * TN * indim * x_itemsize
                   + 2 * indim * bt_cols * 4
                   + 2 * TN * outdim * out_itemsize)
    vmem_limit = int(min(max(vmem_needed + (4 << 20), 32 << 20), vmem_ceiling))

    out = pl.pallas_call(
        kernel,
        out_shape=jax.ShapeDtypeStruct((N, outdim), out_dtype),
        grid_spec=pltpu.PrefetchScalarGridSpec(
            num_scalar_prefetch=0,
            grid=grid,
            in_specs=[
                pl.BlockSpec((TN, indim), lambda i: (i, 0)),
                # Same (tiny) block every step -> DMA'd once, VMEM-resident.
                pl.BlockSpec((indim, bt_cols), lambda i: (0, 0)),
            ],
            out_specs=pl.BlockSpec((TN, outdim), lambda i: (i, 0)),
        ),
        compiler_params=pltpu.CompilerParams(
            dimension_semantics=("parallel",),   # shard rows across v7x's 2 TCs
            vmem_limit_bytes=vmem_limit,
        ),
    )(x2, bt_arg)

    return out.reshape(*orig_shape[:-1], outdim)


if __name__ == "__main__":
    key = jax.random.PRNGKey(0)

    def check(N, mapdim, indim, scale=1.0):
        kx, kb = jax.random.split(jax.random.fold_in(key, mapdim))
        B = jax.random.normal(kb, (mapdim, indim), dtype=jnp.float32) * (scale ** 2)
        x = jax.random.normal(kx, (N, indim), dtype=jnp.float32)

        out = jax.block_until_ready(fourier_features(x, B))

        # Pure-JAX reference.
        xp = 2.0 * math.pi * (x @ B.T)
        ref = jnp.concatenate([jnp.cos(xp), jnp.sin(xp)], axis=-1)
        assert out.shape == (N, 2 * mapdim), out.shape
        err = float(jnp.max(jnp.abs(out - ref)))
        assert err < 2e-3, f"N={N} mapdim={mapdim}: max abs error {err}"

    # PINN-style batch: 3-D coordinates -> 256 Fourier features (lane-aligned
    # two-half store path).
    check(N=64, mapdim=256, indim=3)
    # Non-multiple-of-128 mapdim and ragged N (exercises the lane-select
    # full-width store path and Pallas boundary blocks).
    check(N=77, mapdim=200, indim=3)

    print("KERNEL_OK")
</pallas_src>

<mosaic_0001>
module attributes {stable_mosaic.version = 11 : i64} {
  func.func @_fourier_kernel_aligned(%arg0: i32, %arg1: memref<32x3xf32, #tpu.memory_space<vmem>>, %arg2: memref<3x256xf32, #tpu.memory_space<vmem>>, %arg3: memref<32x512xf32, #tpu.memory_space<vmem>>) attributes {dimension_semantics = [#tpu.dimension_semantics<parallel>], iteration_bounds = array<i64: 2>, scalar_prefetch = 0 : i64, scratch_operands = 0 : i64, tpu.core_type = #tpu.core_type<tc>, window_params = [{transform_indices = @transform_0, window_bounds = array<i64: 32, 3>}, {pipeline_mode = #tpu.pipeline_mode<synchronous>, transform_indices = @transform_1, window_bounds = array<i64: 3, 256>}, {transform_indices = @transform_2, window_bounds = array<i64: 32, 512>}]} {
    %c0 = arith.constant 0 : index
    %c0_0 = arith.constant 0 : index
    %0 = vector.load %arg1[%c0, %c0_0] : memref<32x3xf32, #tpu.memory_space<vmem>>, vector<32x3xf32>
    %c0_1 = arith.constant 0 : index
    %c0_2 = arith.constant 0 : index
    %1 = vector.load %arg2[%c0_1, %c0_2] : memref<3x256xf32, #tpu.memory_space<vmem>>, vector<3x256xf32>
    %2 = vector.extract_strided_slice %0 {offsets = [0, 0], sizes = [32, 1], strides = [1, 1]} : vector<32x3xf32> to vector<32x1xf32>
    %3 = vector.extract_strided_slice %1 {offsets = [0, 0], sizes = [1, 256], strides = [1, 1]} : vector<3x256xf32> to vector<1x256xf32>
    %4 = vector.broadcast %2 : vector<32x1xf32> to vector<32x256xf32>
    %5 = vector.broadcast %3 : vector<1x256xf32> to vector<32x256xf32>
    %6 = arith.mulf %4, %5 : vector<32x256xf32>
    %7 = vector.extract_strided_slice %0 {offsets = [0, 1], sizes = [32, 1], strides = [1, 1]} : vector<32x3xf32> to vector<32x1xf32>
    %8 = vector.extract_strided_slice %1 {offsets = [1, 0], sizes = [1, 256], strides = [1, 1]} : vector<3x256xf32> to vector<1x256xf32>
    %9 = vector.broadcast %7 : vector<32x1xf32> to vector<32x256xf32>
    %10 = vector.broadcast %8 : vector<1x256xf32> to vector<32x256xf32>
    %11 = arith.mulf %9, %10 : vector<32x256xf32>
    %12 = arith.addf %6, %11 : vector<32x256xf32>
    %13 = vector.extract_strided_slice %0 {offsets = [0, 2], sizes = [32, 1], strides = [1, 1]} : vector<32x3xf32> to vector<32x1xf32>
    %14 = vector.extract_strided_slice %1 {offsets = [2, 0], sizes = [1, 256], strides = [1, 1]} : vector<3x256xf32> to vector<1x256xf32>
    %15 = vector.broadcast %13 : vector<32x1xf32> to vector<32x256xf32>
    %16 = vector.broadcast %14 : vector<1x256xf32> to vector<32x256xf32>
    %17 = arith.mulf %15, %16 : vector<32x256xf32>
    %18 = arith.addf %12, %17 : vector<32x256xf32>
    %19 = math.cos %18 : vector<32x256xf32>
    %c0_3 = arith.constant 0 : index
    %c0_4 = arith.constant 0 : index
    %20 = vector.load %arg3[%c0_3, %c0_4] : memref<32x512xf32, #tpu.memory_space<vmem>>, vector<32x256xf32>
    tpu.vector_store %arg3[%c0_3, %c0_4], %19 {strides = array<i32>} : memref<32x512xf32, #tpu.memory_space<vmem>>, vector<32x256xf32>,
    %21 = math.sin %18 : vector<32x256xf32>
    %c0_5 = arith.constant 0 : index
    %c256 = arith.constant 256 : index
    %22 = vector.load %arg3[%c0_5, %c256] : memref<32x512xf32, #tpu.memory_space<vmem>>, vector<32x256xf32>
    tpu.vector_store %arg3[%c0_5, %c256], %21 {strides = array<i32>} : memref<32x512xf32, #tpu.memory_space<vmem>>, vector<32x256xf32>,
    return
  }
  func.func @transform_0(%arg0: i32) -> (i32, i32) {
    %c0_i32 = arith.constant 0 : i32
    %c0_i32_0 = arith.constant 0 : i32
    return %arg0, %c0_i32 : i32, i32
  }
  func.func @transform_1(%arg0: i32) -> (i32, i32) {
    %c0_i32 = arith.constant 0 : i32
    %c0_i32_0 = arith.constant 0 : i32
    %c0_i32_1 = arith.constant 0 : i32
    return %c0_i32, %c0_i32_0 : i32, i32
  }
  func.func @transform_2(%arg0: i32) -> (i32, i32) {
    %c0_i32 = arith.constant 0 : i32
    %c0_i32_0 = arith.constant 0 : i32
    return %arg0, %c0_i32 : i32, i32
  }
}

</mosaic_0001>

<bundles_post_ra>
// kernel: tpu_custom_call.1
= control target key start
LH: loop header
LB: loop body
LE: loop exit
PB: predicated region body
PF: predicated region fallthrough
CT: control target
= control target key end

     0   :  { %7 = vsyncpa [#allocation3], 0  ;;  %s4179_s0 = inlined_call_operand.vmem [shape: f32[64,3], index: 0, kind: input, shape index: {}]   ;;  %s4180_s1 = inlined_call_operand.vmem [shape: f32[3,256], index: 1, kind: input, shape index: {}]   ;;  %s4181_s2 = inlined_call_operand.hbm [shape: f32[64,512], index: 2, kind: output, shape index: {}]  }
   0x1   :  { %9 = vsyncpa [#allocation3 + $0x1], 0  ;;  %s3039_s9 = smov 0   ;;  %s3041_s10 = smov 0  }
   0x2   :  { %s3043_s11 = smov 0   ;;  %s3045_s12 = smov 0  }
   0x3 LB: > { %s3060_s13 = sadd.s32 4294967295, %s3011_s12   ;;  %s2828_s14 = sadd.s32 4294967294, %s3011_s12   ;;  %s3011_s12 = sphi %s3045_s12, %s4201_s12   ;;  %s3007_s11 = sphi %s3043_s11, %s4200_s11   ;;  %s3003_s10 = sphi %s3041_s10, %s4199_s10   ;;  %s2999_s9 = sphi %s3039_s9, %s4198_s9  }
   0x4   : > { %s3064_s15 = sadd.s32 1, %s3011_s12   ;;  %s69_s16 = sadd.s32 1, %s3007_s11 }
   0x5   : > { %s66_s17 = ssub.s32 %s3011_s12, %s3064_s15  ;;  %p79_p0 = scmp.ne.s32.totalorder %s3007_s11, %s3003_s10 }
   0x6   : > { %p67_p1 = scmp.eq.s32.totalorder %s66_s17, 0  ;;  %p80_p2 = scmp.eq.s32.totalorder %s3060_s13, 1 }
   0x7   : > { %p85_p3 = scmp.ne.s32.totalorder %s3003_s10, %s2999_s9  ;;  %p86_p4 = scmp.eq.s32.totalorder %s2828_s14, 1 }
   0x8   : > { %s3075_s18 = scalar_select %p67_p1, %s3007_s11, %s69_s16  }
   0x9   : > { %p3077_p5 = por %p80_p2, %p79_p0  ;;  %p3081_p6 = por %p86_p4, %p85_p3 }
   0xa   : > { %p2831_p7 = scmp.ge.s32.totalorder %s3011_s12, 1  ;;  %p116_p8 = scmp.lt.s32.totalorder %s3011_s12, 3 }
   0xc   : > { %p117_p9 = pnand %p2831_p7, %p116_p8 }
   0xd   : > { %s2833_s21 = sshll.u32 (!%p117_p9), %s3060_s13, 2  ;;  %s135_s28 = sand.u32 (!%p117_p9), 1, %s3003_s10  }
   0xe   : > { %120 = sbr.rel (%p117_p9) target bundleno = 506 (0x1fa), region = 28  ;;  %p139_p10 = scmp.lt.s32.totalorder (!%p117_p9), %s2833_s21, 7 }
   0xf   : > { %s2832_s29 = sshll.u32 (!%p117_p9), %s135_s28, 7  ;;  %s2890_s3 = sshll.u32 (!%p117_p9), %s3060_s13, 7 }
  0x10   : > { %s3451_s30 = scalar_lea.vmem (!%p117_p9), [#allocation2], %s2832_s29  ;;  %s2762_s6 = scalar_lea.hbm (!%p117_p9), %s4181_s2, %s2890_s3 }
  0x11   : > { %s2763_s7 = sshll.u32 (!%p117_p9), %s3451_s30, 4  ;;  %s2765_s8 = sshll.u32 (!%p117_p9), %s2762_s6, 4  ;;  %s2764_s7 = int_to_ptr.vmem [resolvable:$true] %s2763_s7  ;;  %s2766_s8 = int_to_ptr.hbm [resolvable:$true] %s2765_s8 }
  0x12   : > { %s2750_s13 = scalar_lea.sflag (!%p117_p9), [#allocation3], %s135_s28  ;;  %s2963_s14 = sshra.s32 (!%p117_p9), %s2766_s8, 4  ;;  %s2964_s14 = int_to_ptr.hbm [resolvable:$true] %s2963_s14 }
  0x13   : > { %v3013_v0 = vmov 0   ;;  %v3014_v1 = vmov 1   ;;  %s4203_s21 = smov (!%p139_p10, %s2833_s21), 7  ;;  %v3015_v6 = vmov 2   ;;  %v149_v8 = vld [vmem:[%s4180_s1] sm:$0x77]  ;;  %p2970_p0 = scmp.lt.s32.totalorder %s2964_s14, %s4181_s2 }
  0x14   : > { %2942 = vset.pattern.permute.xlu1 %v3013_v0  ;;  %2941 = vset.pattern.permute.xlu0 %v3013_v0  ;;  %s2834_s22 = sshll.u32 %s4203_s21, 3  ;;  %v201_v10 = vperm.slane %v149_v8, 1  ;;  %v202_v11 = vperm.slane %v149_v8, 5  ;;  %v171_v12 = vperm.slane %v149_v8, 0  ;;  %v172_v13 = vperm.slane %v149_v8, 4  ;;  %s2965_s16 = scalar_lea.hbm %s2964_s14, 128 }
  0x15   : > { %2943 = vset.pattern.permute.xlu2 %v3014_v1  ;;  %s142_s25 = scalar_lea.vmem %s4179_s0, %s2834_s22  ;;  %v239_v14 = vperm.slane %v149_v8, 2  ;;  %v240_v15 = vperm.slane %v149_v8, 6  ;;  %p2966_p11 = scmp.ne.s32.totalorder %s2964_s14, %s2965_s16 }
  0x16   : > { %v147_v2 = vld [vmem:[%s142_s25 + $0x10] sm:$0xff]  ;;  %v145_v3 = vld [vmem:[%s142_s25] sm:$0xff]  ;;  %v148_v4 = vld [vmem:[%s142_s25 + $0x18] sm:$0xff]  ;;  %v3096_v16 = vperm.slane %v201_v10, 1  ;;  %v3098_v17 = vperm.slane %v202_v11, 1  ;;  %v3100_v18 = vperm.slane %v171_v12, 0 }
  0x17   : > { %162 = vperm.xlu1 %2942, %v147_v2   ;;  %152 = vperm.xlu0 %2941, %v145_v3   ;;  %v146_v5 = vld [vmem:[%s142_s25 + $0x8] sm:$0xff]  ;;  %v3102_v19 = vperm.slane %v172_v13, 0  ;;  %v3104_v20 = vperm.slane %v239_v14, 2  ;;  %v3106_v21 = vperm.slane %v240_v15, 2  ;;  %v3018_v11 = vmov 2131351028   ;;  %p2967_p12 = pnand %p2966_p11, %p3077_p5 }
  0x18   : > { %186 = vperm.xlu2 %2943, %v145_v3   ;;  %v3019_v14 = vmov 2102212464   ;;  %s2969_s22 = scalar_lea.hbm %s4181_s2, 256 }
  0x19   : > { %p2968_p13 = pneg %p2967_p12  ;;  %p2971_p1 = scmp.lt.s32.totalorder %s2969_s22, %s2965_s16 }
  0x1b   : > { %p2972_p2 = por %p2971_p1, %p2970_p0 }
  0x1d   : > { %p2973_p3 = pnand %p2972_p2, %p2968_p13 }
  0x1f   : > { %167 = vperm.xlu1 %2942, %v148_v4   ;;  %157 = vperm.xlu0 %2941, %v146_v5  }
  0x20   : > { %190 = vperm.xlu2 %2943, %v146_v5  }
  0x27   : > { %2945 = vset.pattern.permute.xlu1 %v3014_v1  ;;  %2944 = vset.pattern.permute.xlu0 %v3014_v1 }
  0x28   : > { %198 = vperm.xlu1 %2945, %v148_v4   ;;  %194 = vperm.xlu0 %2944, %v147_v2  }
  0x29   : > { %2946 = vset.pattern.permute.xlu2 %v3015_v6 }
  0x2a   : > { %224 = vperm.xlu2 %2946, %v145_v3  }
  0x30   : > { %2947 = vset.pattern.permute.xlu1 %v3015_v6  ;;  %2948 = vset.pattern.permute.xlu0 %v3015_v6 }
  0x31   : > { %228 = vperm.xlu1 %2947, %v146_v5   ;;  %236 = vperm.xlu0 %2948, %v148_v4   ;;  %v3016_v5 = vmov 683565275  }
  0x32   : > { %232 = vperm.xlu2 %2946, %v147_v2  }
  0x72   : > { %v187_v7 = vpop.permute.xlu2 %186 }
  0x73   : > { %v207_v23 = vmul.f32 %v3096_v16, %v187_v7  ;;  %v208_v24 = vmul.f32 %v3098_v17, %v187_v7  ;;  %v3017_v7 = vmov 2475754826  }
  0x7a   : > { %v191_v9 = vpop.permute.xlu2 %190 }
  0x7b   : > { %v209_v41 = vmul.f32 %v3096_v16, %v191_v9  ;;  %v210_v45 = vmul.f32 %v3098_v17, %v191_v9 }
  0x84   : > { %v225_v22 = vpop.permute.xlu2 %224 }
  0x85   : > { %v245_v29 = vmul.f32 %v3104_v20, %v225_v22  ;;  %v246_v30 = vmul.f32 %v3106_v21, %v225_v22 }
  0x89   : > { %v3110_v25 = vpop.permute.xlu1 %162  ;;  %v153_v26 = vpop.permute.xlu0 %152 }
  0x8a   : > { %v177_v27 = vmul.f32 %v3100_v18, %v153_v26  ;;  %v178_v28 = vmul.f32 %v3102_v19, %v153_v26 }
  0x8c   : > { %v215_v31 = vadd.f32 %v207_v23, %v177_v27  ;;  %v216_v32 = vadd.f32 %v208_v24, %v178_v28  ;;  %v3020_v23 = vmov 920167782   ;;  %v3021_v27 = vmov 1326507024  }
  0x8e   : > { %v3116_v33 = vadd.f32 %v245_v29, %v215_v31  ;;  %v3118_v34 = vadd.f32 %v246_v30, %v216_v32 }
  0x90   : > { %v261_v35 = vand.u32 2147483647, %v3116_v33  ;;  %v264_v36 = vand.u32 2139095040, %v3116_v33  ;;  %v415_v37 = vand.u32 2147483647, %v3118_v34  ;;  %v418_v38 = vand.u32 2139095040, %v3118_v34 }
  0x91   : > { %v168_v39 = vpop.permute.xlu1 %167  ;;  %v158_v40 = vpop.permute.xlu0 %157 }
  0x92   : > { %v265_v42 = vshrl.u32 %v264_v36, 23  ;;  %v268_v43 = vand.u32 8388607, %v261_v35  ;;  %v3128_v44 = vmul.f32 %v3100_v18, %v168_v39  ;;  %v419_v46 = vshrl.u32 %v418_v38, 23 }
  0x93   : > { %v422_v47 = vand.u32 8388607, %v415_v37  ;;  %v3134_v48 = vmul.f32 %v3102_v19, %v168_v39  ;;  %v179_v51 = vmul.f32 %v3100_v18, %v158_v40  ;;  %v180_v52 = vmul.f32 %v3102_v19, %v158_v40 }
  0x94   : > { %v2835_v49 = vadd.s32 4294967169, %v265_v42  ;;  %v269_v50 = vor.u32 8388608, %v268_v43  ;;  %v2838_v53 = vadd.s32 4294967169, %v419_v46 }
  0x95   : > { %v3138_v55 = vadd.f32 %v209_v41, %v179_v51  ;;  %v3140_v56 = vadd.f32 %v210_v45, %v180_v52  ;;  %v423_v59 = vor.u32 8388608, %v422_v47 }
  0x96   : > { %v271_v54 = vadd.s32 1, %v2835_v49  ;;  %v425_v57 = vadd.s32 1, %v2838_v53  ;;  %v3142_v58 = vshll.u32 %v269_v50, 8 }
  0x97   : > { %v3149_v3 = vshll.u32 %v423_v59, 8 }
  0x98   : > { %vm272_vm0 = vcmp.gt.s32.totalorder %v271_v54, 0  ;;  %vm426_vm1 = vcmp.gt.s32.totalorder %v425_v57, 0  ;;  %v3145_v1 = vand.u32 65535, %v3142_v58  ;;  %v311_v9 = vshrl.u32 %v3142_v58, 16 }
  0x99   : > { %v273_v60 = vsel %vm272_vm0, %v271_v54, 0  ;;  %v427_v62 = vsel %vm426_vm1, %v425_v57, 0 }
  0x9a   : > { %v275_v61 = vand.u32 31, %v273_v60  ;;  %v3147_v2 = vand.u32 31, %v427_v62  ;;  %v3151_v4 = vshrl.u32 %v273_v60, 5 }
  0x9c   : > { %v276_v63 = vsub.s32 32, %v275_v61  ;;  %v278_v6 = vshll.u32 %v3016_v5, %v275_v61  ;;  %v281_v8 = vshll.u32 %v3017_v7, %v275_v61  ;;  %v284_v13 = vshll.u32 %v3018_v11, %v275_v61 }
  0x9d   : > { %v287_v22 = vshll.u32 %v3019_v14, %v275_v61  ;;  %v290_v26 = vshll.u32 %v3020_v23, %v275_v61  ;;  %v3165_v32 = vsub.s32 32, %v3147_v2  ;;  %vm293_vm2 = vcmp.lt.s32.totalorder %v3151_v4, 1 }
  0x9e   : > { %v279_v10 = vshrl.u32 %v3017_v7, %v276_v63  ;;  %v282_v12 = vshrl.u32 %v3018_v11, %v276_v63  ;;  %v285_v15 = vshrl.u32 %v3019_v14, %v276_v63  ;;  %v288_v24 = vshrl.u32 %v3020_v23, %v276_v63 }
  0x9f   : > { %v291_v28 = vshrl.u32 %v3021_v27, %v276_v63  ;;  %vm294_vm3 = vcmp.lt.s32.totalorder %v3151_v4, 2  ;;  %v277_v39 = vshrl.u32 %v3016_v5, %v276_v63  ;;  %vm296_vm4 = vcmp.lt.s32.totalorder %v3151_v4, 4 }
  0xa0   : > { %v280_v29 = vor.u32 %v279_v10, %v278_v6  ;;  %v283_v30 = vor.u32 %v282_v12, %v281_v8  ;;  %v286_v31 = vor.u32 %v285_v15, %v284_v13  ;;  %v289_v36 = vor.u32 %v288_v24, %v287_v22 }
  0xa1   : > { %v292_v38 = vor.u32 %v291_v28, %v290_v26  ;;  %vm295_vm5 = vcmp.lt.s32.totalorder %v3151_v4, 3  ;;  %v432_v45 = vshll.u32 %v3016_v5, %v3147_v2  ;;  %v433_v50 = vshrl.u32 %v3017_v7, %v3165_v32 }
  0xa2   : > { %v301_v40 = vsel %vm293_vm2, %v280_v29, %v283_v30  ;;  %v305_v41 = vsel %vm293_vm2, %v283_v30, %v286_v31  ;;  %v302_v42 = vsel %vm296_vm4, %v289_v36, 920167782  ;;  %v298_v46 = vsel %vm296_vm4, %v286_v31, 2102212464 }
  0xa3   : > { %v306_v43 = vsel %vm296_vm4, %v292_v38, 1326507024  ;;  %v303_v47 = vsel %vm295_vm5, %v286_v31, %v302_v42  ;;  %v435_v53 = vshll.u32 %v3017_v7, %v3147_v2  ;;  %v436_v54 = vshrl.u32 %v3018_v11, %v3165_v32 }
  0xa4   : > { %v307_v49 = vsel %vm295_vm5, %v289_v36, %v306_v43  ;;  %v304_v51 = vsel %vm294_vm3, %v301_v40, %v303_v47  ;;  %v297_v63 = vsel %vm293_vm2, %v277_v39, %v280_v29  ;;  %v299_v6 = vsel %vm295_vm5, %v283_v30, %v298_v46 }
  0xa5   : > { %v308_v52 = vsel %vm294_vm3, %v305_v41, %v307_v49  ;;  %v334_v60 = vand.u32 65535, %v304_v51  ;;  %v335_v61 = vshrl.u32 %v304_v51, 16  ;;  %v3196_v8 = vshrl.u32 %v427_v62, 5 }
  0xa6   : > { %v312_v57 = vand.u32 65535, %v308_v52  ;;  %v313_v59 = vshrl.u32 %v308_v52, 16  ;;  %v3198_v10 = vor.u32 %v433_v50, %v432_v45  ;;  %v3201_v15 = vor.u32 %v436_v54, %v435_v53 }
  0xa7   : > { %v439_v22 = vshrl.u32 %v3019_v14, %v3165_v32  ;;  %v337_v26 = vmul.u32 %v335_v61, %v3145_v1  ;;  %v338_v28 = vmul.u32 %v334_v60, %v311_v9  ;;  %v438_v29 = vshll.u32 %v3018_v11, %v3147_v2 }
  0xa8   : > { %v315_v12 = vmul.u32 %v313_v59, %v3145_v1  ;;  %v316_v13 = vmul.u32 %v312_v57, %v311_v9  ;;  %v314_v24 = vmul.u32 %v312_v57, %v3145_v1  ;;  %v317_v62 = vmul.u32 %v313_v59, %v311_v9 }
  0xa9   : > { %v336_v31 = vmul.u32 %v334_v60, %v3145_v1  ;;  %v339_v36 = vmul.u32 %v335_v61, %v311_v9  ;;  %v340_v41 = vshll.u32 %v337_v26, 16  ;;  %v342_v43 = vshll.u32 %v338_v28, 16 }
  0xaa   : > { %v318_v30 = vshll.u32 %v315_v12, 16  ;;  %v319_v38 = vshrl.u32 %v315_v12, 16  ;;  %v320_v39 = vshll.u32 %v316_v13, 16  ;;  %v321_v40 = vshrl.u32 %v316_v13, 16 }
  0xab   : > { %v3210_v45 = vor.u32 %v439_v22, %v438_v29  ;;  %vm344_vm7 = vc.u32 %v336_v31, %v340_v41  ;;  %v346_v47 = vadd.s32 %v340_v41, %v336_v31  ;;  %v442_v49 = vshrl.u32 %v3020_v23, %v3165_v32 }
  0xac   : > { %vm322_vm6 = vc.u32 %v314_v24, %v318_v30  ;;  %v324_v42 = vadd.s32 %v318_v30, %v314_v24  ;;  %v345_v1 = vsel %vm344_vm7, 1, %v3013_v0  ;;  %v441_v9 = vshll.u32 %v3019_v14, %v3147_v2 }
  0xad   : > { %v323_v46 = vsel %vm322_vm6, 1, %v3013_v0  ;;  %v347_v52 = vadd.s32 %v345_v1, %v339_v36  ;;  %vm348_vm9 = vc.u32 %v346_v47, %v342_v43  ;;  %v444_v53 = vshll.u32 %v3020_v23, %v3147_v2 }
  0xae   : > { %v325_v50 = vadd.s32 %v323_v46, %v317_v62  ;;  %vm326_vm8 = vc.u32 %v324_v42, %v320_v39  ;;  %v349_v57 = vsel %vm348_vm9, 1, %v3013_v0  ;;  %v443_v59 = vor.u32 %v442_v49, %v441_v9 }
  0xaf   : > { %v327_v51 = vsel %vm326_vm8, 1, %v3013_v0  ;;  %v445_v60 = vshrl.u32 %v3021_v27, %v3165_v32  ;;  %v341_v61 = vshrl.u32 %v337_v26, 16  ;;  %v343_v12 = vshrl.u32 %v338_v28, 16 }
  0xb0   : > { %v329_v54 = vadd.s32 %v327_v51, %v325_v50  ;;  %v3224_v13 = vadd.s32 %v346_v47, %v342_v43  ;;  %v351_v22 = vadd.s32 %v349_v57, %v347_v52  ;;  %vm447_vm10 = vcmp.lt.s32.totalorder %v3196_v8, 1 }
  0xb1   : > { %v446_v29 = vor.u32 %v445_v60, %v444_v53  ;;  %vm450_vm11 = vcmp.lt.s32.totalorder %v3196_v8, 4  ;;  %vm449_vm12 = vcmp.lt.s32.totalorder %v3196_v8, 3  ;;  %v455_v2 = vsel %vm447_vm10, %v3198_v10, %v3201_v15 }
  0xb2   : > { %v330_v24 = vadd.s32 %v329_v54, %v319_v38  ;;  %v352_v62 = vadd.s32 %v351_v22, %v341_v61  ;;  %v456_v26 = vsel %vm450_vm11, %v443_v59, 920167782  ;;  %vm448_vm13 = vcmp.lt.s32.totalorder %v3196_v8, 2 }
  0xb3   : > { %v457_v30 = vsel %vm449_vm12, %v3210_v45, %v456_v26  ;;  %v459_v31 = vsel %vm447_vm10, %v3201_v15, %v3210_v45  ;;  %v300_v36 = vsel %vm294_vm3, %v297_v63, %v299_v6  ;;  %v464_v42 = vand.u32 65535, %v3149_v3 }
  0xb4   : > { %v3235_v28 = vadd.s32 %v330_v24, %v321_v40  ;;  %v353_v38 = vadd.s32 %v352_v62, %v343_v12  ;;  %v458_v39 = vsel %vm448_vm13, %v455_v2, %v457_v30  ;;  %v460_v40 = vsel %vm450_vm11, %v446_v29, 1326507024 }
  0xb5   : > { %v461_v41 = vsel %vm449_vm12, %v443_v59, %v460_v40  ;;  %v488_v43 = vand.u32 65535, %v458_v39  ;;  %v465_v63 = vshrl.u32 %v3149_v3, 16  ;;  %v489_v6 = vshrl.u32 %v458_v39, 16 }
  0xb6   : > { %vm356_vm14 = vc.u32 %v3235_v28, %v3224_v13  ;;  %v357_v46 = vadd.s32 1, %v353_v38  ;;  %v462_v4 = vsel %vm448_vm13, %v459_v31, %v461_v41  ;;  %v354_v47 = vmul.u32 %v3142_v58, %v300_v36  ;;  %v195_v31 = vpop.permute.xlu0 %194 }
  0xb7   : > { %v466_v49 = vand.u32 65535, %v462_v4  ;;  %v467_v50 = vshrl.u32 %v462_v4, 16  ;;  %v491_v9 = vmul.u32 %v489_v6, %v464_v42  ;;  %v492_v51 = vmul.u32 %v488_v43, %v465_v63 }
  0xb8   : > { %v358_v1 = vsel %vm356_vm14, %v357_v46, %v353_v38  ;;  %v490_v57 = vmul.u32 %v488_v43, %v464_v42  ;;  %v493_v59 = vmul.u32 %v489_v6, %v465_v63  ;;  %v181_v36 = vmul.f32 %v3100_v18, %v3110_v25 }
  0xb9   : > { %v359_v52 = vadd.s32 %v358_v1, %v354_v47  ;;  %v469_v53 = vmul.u32 %v467_v50, %v464_v42  ;;  %v470_v54 = vmul.u32 %v466_v49, %v465_v63  ;;  %v494_v60 = vshll.u32 %v491_v9, 16 }
  0xba   : > { %v468_v12 = vmul.u32 %v466_v49, %v464_v42  ;;  %v471_v22 = vmul.u32 %v467_v50, %v465_v63  ;;  %v496_v62 = vshll.u32 %v492_v51, 16  ;;  %v452_v41 = vsel %vm450_vm11, %v3210_v45, 2102212464  ;;  %v233_v63 = vpop.permute.xlu2 %232 }
  0xbb   : > { %v360_v61 = vadd.s32 536870912, %v359_v52  ;;  %v472_v24 = vshll.u32 %v469_v53, 16  ;;  %v474_v29 = vshll.u32 %v470_v54, 16  ;;  %vm498_vm15 = vc.u32 %v490_v57, %v494_v60 }
  0xbc   : > { %v500_v2 = vadd.s32 %v494_v60, %v490_v57  ;;  %v499_v30 = vsel %vm498_vm15, 1, %v3013_v0  ;;  %v431_v43 = vshrl.u32 %v3016_v5, %v3165_v32  ;;  %v211_v18 = vmul.f32 %v3096_v16, %v195_v31 }
  0xbd   : > { %v361_v58 = vshrl.u32 %v360_v61, 30  ;;  %vm476_vm0 = vc.u32 %v468_v12, %v472_v24  ;;  %v478_v26 = vadd.s32 %v472_v24, %v468_v12  ;;  %v501_v39 = vadd.s32 %v499_v30, %v493_v59 }
  0xbe   : > { %v477_v38 = vsel %vm476_vm0, 1, %v3013_v0  ;;  %vm502_vm1 = vc.u32 %v500_v2, %v496_v62  ;;  %v473_v47 = vshrl.u32 %v469_v53, 16  ;;  %v451_v45 = vsel %vm447_vm10, %v431_v43, %v3198_v10 }
  0xbf   : > { %v362_v40 = vshll.u32 %v361_v58, 30  ;;  %v479_v42 = vadd.s32 %v477_v38, %v471_v22  ;;  %vm480_vm2 = vc.u32 %v478_v26, %v474_v29  ;;  %v503_v4 = vsel %vm502_vm1, 1, %v3013_v0 }
  0xc0   : > { %v481_v46 = vsel %vm480_vm2, 1, %v3013_v0  ;;  %v505_v50 = vadd.s32 %v503_v4, %v501_v39  ;;  %v453_v1 = vsel %vm449_vm12, %v3201_v15, %v452_v41  ;;  %v495_v32 = vshrl.u32 %v491_v9, 16 }
  0xc1   : > { %v363_v6 = vsub.s32 %v359_v52, %v362_v40  ;;  %v483_v49 = vadd.s32 %v481_v46, %v479_v42  ;;  %v219_v57 = vadd.f32 %v211_v18, %v181_v36  ;;  %v249_v61 = vmul.f32 %v3104_v20, %v233_v63 }
  0xc2   : > { %v475_v12 = vshrl.u32 %v470_v54, 16  ;;  %v497_v52 = vshrl.u32 %v492_v51, 16  ;;  %v506_v53 = vadd.s32 %v505_v50, %v495_v32  ;;  %v454_v24 = vsel %vm448_vm13, %v451_v45, %v453_v1 }
  0xc3   : > { %vm364_vm3 = vcmp.lt.s32.totalorder %v363_v6, 0  ;;  %v365_v59 = vsub.s32 0, %v363_v6  ;;  %v484_v60 = vadd.s32 %v483_v49, %v473_v47  ;;  %v504_v26 = vadd.s32 %v500_v2, %v496_v62 }
  0xc4   : > { %v507_v30 = vadd.s32 %v506_v53, %v497_v52  ;;  %v385_v38 = vsub.s32 4, %v361_v58  ;;  %v3281_v15 = vadd.f32 %v249_v61, %v219_v57  ;;  %v182_v39 = vmul.f32 %v3102_v19, %v3110_v25 }
  0xc5   : > { %v366_v22 = vsel %vm364_vm3, %v365_v59, %v363_v6  ;;  %v485_v10 = vadd.s32 %v484_v60, %v475_v12  ;;  %v508_v51 = vmul.u32 %v3149_v3, %v454_v24  ;;  %v212_v54 = vmul.f32 %v3098_v17, %v195_v31 }
  0xc6   : > { %v367_v29 = vclz %v366_v22  ;;  %v511_v36 = vadd.s32 1, %v507_v30  ;;  %v4183_v8 = vand.u32 2147483647, %v3281_v15  ;;  %vm263_vm5 = vcmp.lt.s32.totalorder %v3116_v33, 0 }
  0xc7   : > { %vm510_vm4 = vc.u32 %v485_v10, %v504_v26  ;;  %v880_v2 = vand.u32 2139095040, %v3281_v15  ;;  %v355_v40 = vadd.s32 %v3224_v13, %v3235_v28  ;;  %v386_v42 = vsel %vm263_vm5, %v385_v38, %v361_v58 }
  0xc8   : > { %v2836_v9 = vadd.s32 4294967294, %v367_v29  ;;  %v512_v62 = vsel %vm510_vm4, %v511_v36, %v507_v30  ;;  %v884_v31 = vand.u32 8388607, %v4183_v8  ;;  %vm3298_vm7 = vcmp.le.f32.partialorder %v261_v35, 0.7853982 }
  0xc9   : > { %v513_v19 = vadd.s32 %v512_v62, %v508_v51  ;;  %v881_v43 = vshrl.u32 %v880_v2, 23  ;;  %v220_v18 = vadd.f32 %v212_v54, %v182_v39  ;;  %v250_v13 = vmul.f32 %v3106_v21, %v233_v63 }
  0xca   : > { %vm2837_vm6 = vcmp.lt.s32.totalorder %v2836_v9, 0  ;;  %v388_v50 = vsel %vm3298_vm7, 0, %v386_v42  ;;  %v885_v57 = vor.u32 8388608, %v884_v31  ;;  %vm3309_vm8 = vcmp.le.f32.partialorder %v415_v37, 0.7853982 }
  0xcb   : > { %v370_v41 = vsel %vm2837_vm6, 0, %v2836_v9  ;;  %v514_v4 = vadd.s32 536870912, %v513_v19  ;;  %v2847_v49 = vadd.s32 4294967169, %v881_v43  ;;  %v3305_v61 = vadd.f32 %v250_v13, %v220_v18 }
  0xcc   : > { %v371_v25 = vsub.s32 32, %v370_v41  ;;  %v375_v3 = vsub.s32 4294967266, %v370_v41  ;;  %v372_v28 = vshll.u32 %v363_v6, %v370_v41  ;;  %vm417_vm9 = vcmp.lt.s32.totalorder %v3118_v34, 0 }
  0xcd   : > { %v515_v45 = vshrl.u32 %v514_v4, 30  ;;  %v887_v59 = vadd.s32 1, %v2847_v49  ;;  %v1645_v53 = vadd.s32 3, %v388_v50  ;;  %v3316_v38 = vshll.u32 %v885_v57, 8 }
  0xce   : > { %v373_v47 = vshrl.u32 %v355_v40, %v371_v25  ;;  %v376_v58 = vadd.s32 127, %v375_v3  ;;  %v4182_v37 = vand.u32 2147483647, %v3305_v61  ;;  %v1034_v36 = vand.u32 2139095040, %v3305_v61 }
  0xcf   : > { %v516_v35 = vshll.u32 %v515_v45, 30  ;;  %v539_v60 = vsub.s32 4, %v515_v45  ;;  %vm888_vm10 = vcmp.gt.s32.totalorder %v887_v59, 0  ;;  %v3324_v62 = vand.u32 3, %v388_v50 }
  0xd0   : > { %v374_v1 = vor.u32 %v373_v47, %v372_v28  ;;  %v377_v32 = vshll.u32 %v376_v58, 23  ;;  %v889_v22 = vsel %vm888_vm10, %v887_v59, 0  ;;  %v509_v2 = vadd.s32 %v504_v26, %v485_v10 }
  0xd1   : > { %v517_v6 = vsub.s32 %v513_v19, %v516_v35  ;;  %v540_v52 = vsel %vm417_vm9, %v539_v60, %v515_v45  ;;  %v891_v30 = vand.u32 31, %v889_v22  ;;  %v3326_v41 = vand.u32 3, %v1645_v53 }
  0xd2   : > { %v378_v12 = vor.u32 4788187, %v377_v32  ;;  %v381_v29 = vcvt.s32.f32 %v374_v1  ;;  %v3322_v51 = vsel %vm3309_vm8, 0, %v540_v52  ;;  %v3329_v25 = vand.u32 65535, %v3316_v38 }
  0xd3   : > { %vm518_vm11 = vcmp.lt.s32.totalorder %v517_v6, 0  ;;  %v519_v9 = vsub.s32 0, %v517_v6  ;;  %v892_v54 = vsub.s32 32, %v891_v30  ;;  %v3332_v3 = vshrl.u32 %v3316_v38, 16 }
  0xd4   : > { %v379_v24 = vand.u32 2147483647, %v378_v12  ;;  %v3335_v43 = vadd.s32 3, %v3322_v51  ;;  %v3337_v31 = vshrl.u32 %v889_v22, 5  ;;  %v3339_v4 = vshrl.u32 %v1034_v36, 23 }
  0xd5   : > { %v520_v40 = vsel %vm518_vm11, %v519_v9, %v517_v6  ;;  %v3343_v10 = vand.u32 8388607, %v4182_v37  ;;  %v894_v13 = vshll.u32 %v3016_v5, %v891_v30  ;;  %v895_v28 = vshrl.u32 %v3017_v7, %v892_v54 }
  0xd6   : > { %v382_v39 = vmul.f32 %v381_v29, %v379_v24  ;;  %v521_v19 = vclz %v520_v40  ;;  %v3355_v58 = vshrl.u32 %v3016_v5, %v892_v54  ;;  %v897_v49 = vshll.u32 %v3017_v7, %v891_v30 }
  0xd7   : > { %v898_v50 = vshrl.u32 %v3018_v11, %v892_v54  ;;  %v900_v1 = vshll.u32 %v3018_v11, %v891_v30  ;;  %v901_v32 = vshrl.u32 %v3019_v14, %v892_v54  ;;  %v903_v46 = vshll.u32 %v3019_v14, %v891_v30 }
  0xd8   : > { %v383_v42 = vxor.u32 2147483648, %v382_v39  ;;  %v2839_v18 = vadd.s32 4294967294, %v521_v19  ;;  %v904_v59 = vshrl.u32 %v3020_v23, %v892_v54  ;;  %v907_v35 = vshrl.u32 %v3021_v27, %v892_v54 }
  0xd9   : > { %v896_v53 = vor.u32 %v895_v28, %v894_v13  ;;  %v3366_v24 = vor.u32 %v898_v50, %v897_v49  ;;  %v906_v9 = vshll.u32 %v3020_v23, %v891_v30  ;;  %vm909_vm13 = vcmp.lt.s32.totalorder %v3337_v31, 1 }
  0xda   : > { %v384_v26 = vsel %vm263_vm5, %v383_v42, %v382_v39  ;;  %vm2840_vm12 = vcmp.lt.s32.totalorder %v2839_v18, 0  ;;  %v905_v29 = vor.u32 %v904_v59, %v903_v46  ;;  %vm912_vm14 = vcmp.lt.s32.totalorder %v3337_v31, 4 }
  0xdb   : > { %v3352_v47 = vsel %vm3298_vm7, %v3116_v33, %v384_v26  ;;  %v524_v57 = vsel %vm2840_vm12, 0, %v2839_v18  ;;  %v902_v26 = vor.u32 %v901_v32, %v900_v1  ;;  %v908_v18 = vor.u32 %v907_v35, %v906_v9 }
  0xdc   : > { %v389_v45 = vmul.f32 %v3352_v47, %v3352_v47  ;;  %v525_v52 = vsub.s32 32, %v524_v57  ;;  %v529_v22 = vsub.s32 4294967266, %v524_v57  ;;  %v526_v40 = vshll.u32 %v517_v6, %v524_v57 }
  0xdd   : > { %vm910_vm15 = vcmp.lt.s32.totalorder %v3337_v31, 2  ;;  %v917_v30 = vsel %vm909_vm13, %v896_v53, %v3366_v24  ;;  %v918_v6 = vsel %vm912_vm14, %v905_v29, 920167782  ;;  %vm410_vm0 = vcmp.eq.s32.totalorder %v3324_v62, 2 }
  0xde   : > { %v390_v60 = vmul.f32 -0.001358992, %v389_v45  ;;  %v397_v12 = vmul.f32 -0.00019511016, %v389_v45  ;;  %v527_v42 = vshrl.u32 %v509_v2, %v525_v52  ;;  %v530_v19 = vadd.s32 127, %v529_v22 }
  0xdf   : > { %vm1651_vm1 = vcmp.eq.s32.totalorder %v3326_v41, 2  ;;  %vm911_vm2 = vcmp.lt.s32.totalorder %v3337_v31, 3  ;;  %vm407_vm3 = vcmp.eq.s32.totalorder %v3324_v62, 0  ;;  %vm1648_vm4 = vcmp.eq.s32.totalorder %v3326_v41, 0 }
  0xe0   : > { %v391_v36 = vadd.f32 0.041655596, %v390_v60  ;;  %v398_v39 = vadd.f32 0.008332121, %v397_v12  ;;  %v528_v8 = vor.u32 %v527_v42, %v526_v40  ;;  %v531_v13 = vshll.u32 %v530_v19, 23 }
  0xe1   : > { %v919_v1 = vsel %vm911_vm2, %v902_v26, %v918_v6  ;;  %vm406_vm5 = vcmp.lt.s32.totalorder %v3324_v62, 2  ;;  %vm1647_vm6 = vcmp.lt.s32.totalorder %v3326_v41, 2  ;;  %vm404_vm7 = vweird.f32 %v3116_v33 }
  0xe2   : > { %v392_v54 = vmul.f32 %v391_v36, %v389_v45  ;;  %v399_v37 = vmul.f32 %v398_v39, %v389_v45  ;;  %v535_v49 = vcvt.s32.f32 %v528_v8  ;;  %v532_v50 = vor.u32 4788187, %v531_v13 }
  0xe3   : > { %v922_v8 = vsel %vm912_vm14, %v908_v18, 1326507024  ;;  %v920_v46 = vsel %vm910_vm15, %v917_v30, %v919_v1  ;;  %v3400_v40 = vand.u32 3, %v3322_v51  ;;  %v3408_v42 = vsel %vm909_vm13, %v3355_v58, %v896_v53 }
  0xe4   : > { %v393_v2 = vadd.f32 -0.4999988, %v392_v54  ;;  %v400_v28 = vadd.f32 -0.16666654, %v399_v37  ;;  %v921_v37 = vsel %vm909_vm13, %v3366_v24, %v902_v26  ;;  %v923_v59 = vsel %vm911_vm2, %v905_v29, %v922_v8 }
  0xe5   : > { %v533_v35 = vand.u32 2147483647, %v532_v50  ;;  %v924_v60 = vsel %vm910_vm15, %v921_v37, %v923_v59  ;;  %v950_v12 = vand.u32 65535, %v920_v46  ;;  %v951_v52 = vshrl.u32 %v920_v46, 16 }
  0xe6   : > { %v394_v32 = vmul.f32 %v393_v2, %v389_v45  ;;  %v401_v57 = vmul.f32 %v400_v28, %v389_v45  ;;  %v928_v9 = vand.u32 65535, %v924_v60  ;;  %v929_v36 = vshrl.u32 %v924_v60, 16 }
  0xe7   : > { %v536_v39 = vmul.f32 %v535_v49, %v533_v35  ;;  %v3403_v29 = vand.u32 3, %v3335_v43  ;;  %v914_v54 = vsel %vm912_vm14, %v902_v26, 2102212464  ;;  %v3418_v43 = vmul.u32 %v951_v52, %v3329_v25 }
  0xe8   : > { %v395_v45 = vadd.f32 1.0, %v394_v32  ;;  %v402_v22 = vadd.f32 1.0, %v401_v57  ;;  %v931_v13 = vmul.u32 %v929_v36, %v3329_v25  ;;  %v932_v30 = vmul.u32 %v928_v9, %v3332_v3 }
  0xe9   : > { %v537_v51 = vxor.u32 2147483648, %v536_v39  ;;  %v3421_v6 = vmul.u32 %v950_v12, %v3332_v3  ;;  %v933_v53 = vmul.u32 %v929_v36, %v3332_v3  ;;  %v952_v62 = vmul.u32 %v950_v12, %v3329_v25 }
  0xea   : > { %v403_v19 = vmul.f32 %v402_v22, %v3352_v47  ;;  %v411_v18 = vxor.u32 2147483648, %v395_v45  ;;  %v930_v47 = vmul.u32 %v928_v9, %v3329_v25  ;;  %v934_v2 = vshll.u32 %v931_v13, 16 }
  0xeb   : > { %v538_v28 = vsel %vm417_vm9, %v537_v51, %v536_v39  ;;  %v936_v50 = vshll.u32 %v932_v30, 16  ;;  %v956_v41 = vshll.u32 %v3418_v43, 16  ;;  %v935_v36 = vshrl.u32 %v931_v13, 16 }
  0xec   : > { %v408_v58 = vxor.u32 2147483648, %v403_v19  ;;  %v412_v26 = vsel %vm410_vm0, %v411_v18, %v403_v19  ;;  %v1653_v49 = vsel %vm1651_vm1, %v411_v18, %v403_v19  ;;  %v3436_v37 = vsel %vm3309_vm8, %v3118_v34, %v538_v28 }
  0xed   : > { %vm938_vm10 = vc.u32 %v930_v47, %v934_v2  ;;  %v543_v57 = vmul.f32 %v3436_v37, %v3436_v37  ;;  %v940_v60 = vadd.s32 %v934_v2, %v930_v47  ;;  %v955_v39 = vmul.u32 %v951_v52, %v3332_v3 }
  0xee   : > { %v409_v1 = vsel %vm407_vm3, %v395_v45, %v408_v58  ;;  %v1650_v8 = vsel %vm1648_vm4, %v395_v45, %v408_v58  ;;  %v939_v59 = vsel %vm938_vm10, 1, %v3013_v0  ;;  %v958_v33 = vshll.u32 %v3421_v6, 16 }
  0xef   : > { %v413_v32 = vsel %vm406_vm5, %v409_v1, %v412_v26  ;;  %v1654_v46 = vsel %vm1647_vm6, %v1650_v8, %v1653_v49  ;;  %v941_v45 = vadd.s32 %v939_v59, %v933_v53  ;;  %v544_v22 = vmul.f32 -0.001358992, %v543_v57 }
  0xf0   : > { %v414_v63 = vsel %vm404_vm7, nan, %v413_v32  ;;  %v1655_v35 = vsel %vm404_vm7, nan, %v1654_v46  ;;  %v551_v9 = vmul.f32 -0.00019511016, %v543_v57  ;;  %vm942_vm8 = vc.u32 %v940_v60, %v936_v50 }
  0xf1   : > { %1493 = vst [vmem:[%s3451_s30] sm:$0xff] %v414_v63  ;;  %v545_v19 = vadd.f32 0.041655596, %v544_v22  ;;  %v943_v51 = vsel %vm942_vm8, 1, %v3013_v0  ;;  %vm960_vm9 = vc.u32 %v952_v62, %v956_v41  ;;  %v962_v53 = vadd.s32 %v956_v41, %v952_v62 }
  0xf2   : > { %2741 = vst [vmem:[%s3451_s30 + $0x10] sm:$0xff] %v1655_v35  ;;  %v552_v18 = vadd.f32 0.008332121, %v551_v9  ;;  %v945_v58 = vadd.s32 %v943_v51, %v941_v45  ;;  %v961_v47 = vsel %vm960_vm9, 1, %v3013_v0  ;;  %v2850_v25 = vadd.s32 4294967169, %v3339_v4 }
  0xf3   : > { %v546_v12 = vmul.f32 %v545_v19, %v543_v57  ;;  %v915_v13 = vsel %vm911_vm2, %v3366_v24, %v914_v54  ;;  %v963_v3 = vadd.s32 %v961_v47, %v955_v39  ;;  %v937_v52 = vshrl.u32 %v932_v30, 16 }
  0xf4   : > { %v553_v2 = vmul.f32 %v552_v18, %v543_v57  ;;  %v946_v26 = vadd.s32 %v945_v58, %v935_v36  ;;  %vm964_vm11 = vc.u32 %v962_v53, %v958_v33  ;;  %v1041_v28 = vadd.s32 1, %v2850_v25 }
  0xf5   : > { %v547_v49 = vadd.f32 -0.4999988, %v546_v12  ;;  %vm564_vm12 = vcmp.eq.s32.totalorder %v3400_v40, 2  ;;  %v965_v1 = vsel %vm964_vm11, 1, %v3013_v0  ;;  %vm561_vm13 = vcmp.eq.s32.totalorder %v3400_v40, 0 }
  0xf6   : > { %v554_v50 = vadd.f32 -0.16666654, %v553_v2  ;;  %v3468_v4 = vadd.s32 %v946_v26, %v937_v52  ;;  %v957_v8 = vshrl.u32 %v3418_v43, 16  ;;  %v967_v32 = vadd.s32 %v965_v1, %v963_v3  ;;  %v3509_v52 = vpop.permute.xlu1 %198 }
  0xf7   : > { %vm1042_vm14 = vcmp.gt.s32.totalorder %v1041_v28, 0  ;;  %v548_v24 = vmul.f32 %v547_v49, %v543_v57  ;;  %vm560_vm0 = vcmp.lt.s32.totalorder %v3400_v40, 2  ;;  %vm1802_vm1 = vcmp.lt.s32.totalorder %v3403_v29, 2 }
  0xf8   : > { %v555_v54 = vmul.f32 %v554_v50, %v543_v57  ;;  %v916_v30 = vsel %vm910_vm15, %v3408_v42, %v915_v13  ;;  %v1043_v46 = vsel %vm1042_vm14, %v1041_v28, 0  ;;  %vm558_vm2 = vweird.f32 %v3118_v34 }
  0xf9   : > { %vm1803_vm3 = vcmp.eq.s32.totalorder %v3403_v29, 0  ;;  %v959_v59 = vshrl.u32 %v3421_v6, 16  ;;  %v3479_v43 = vadd.s32 %v962_v53, %v958_v33  ;;  %v968_v63 = vadd.s32 %v967_v32, %v957_v8 }
  0xfa   : > { %v549_v35 = vadd.f32 1.0, %v548_v24  ;;  %v556_v57 = vadd.f32 1.0, %v555_v54  ;;  %vm1806_vm4 = vcmp.eq.s32.totalorder %v3403_v29, 2  ;;  %v1045_v60 = vand.u32 31, %v1043_v46 }
  0xfb   : > { %v969_v45 = vadd.s32 %v968_v63, %v959_v59  ;;  %v970_v22 = vmul.u32 %v3316_v38, %v916_v30  ;;  %vm972_vm15 = vc.u32 %v3468_v4, %v3479_v43  ;;  %v1039_v31 = vor.u32 8388608, %v3343_v10 }
  0xfc   : > { %v557_v42 = vmul.f32 %v556_v57, %v3436_v37  ;;  %v565_v9 = vxor.u32 2147483648, %v549_v35  ;;  %v3487_v6 = vshrl.u32 %v1043_v46, 5  ;;  %v1046_v62 = vsub.s32 32, %v1045_v60 }
  0xfd   : > { %v973_v41 = vadd.s32 1, %v969_v45  ;;  %v1048_v36 = vshll.u32 %v3016_v5, %v1045_v60  ;;  %v1051_v39 = vshll.u32 %v3017_v7, %v1045_v60  ;;  %v1054_v33 = vshll.u32 %v3018_v11, %v1045_v60 }
  0xfe   : > { %v562_v19 = vxor.u32 2147483648, %v557_v42  ;;  %v566_v38 = vsel %vm564_vm12, %v565_v9, %v557_v42  ;;  %v1808_v10 = vsel %vm1806_vm4, %v565_v9, %v557_v42  ;;  %v1057_v37 = vshll.u32 %v3019_v14, %v1045_v60 }
  0xff   : > { %v974_v18 = vsel %vm972_vm15, %v973_v41, %v969_v45  ;;  %v1049_v51 = vshrl.u32 %v3017_v7, %v1046_v62  ;;  %v1052_v58 = vshrl.u32 %v3018_v11, %v1046_v62  ;;  %v1055_v47 = vshrl.u32 %v3019_v14, %v1046_v62 }
 0x100   : > { %v563_v53 = vsel %vm561_vm13, %v549_v35, %v562_v19  ;;  %v1805_v25 = vsel %vm1803_vm3, %v549_v35, %v562_v19  ;;  %v975_v12 = vadd.s32 %v974_v18, %v970_v22  ;;  %v1058_v2 = vshrl.u32 %v3020_v23, %v1046_v62 }
 0x101   : > { %v567_v13 = vsel %vm560_vm0, %v563_v53, %v566_v38  ;;  %v1809_v3 = vsel %vm1802_vm1, %v1805_v25, %v1808_v10  ;;  %v1050_v26 = vor.u32 %v1049_v51, %v1048_v36  ;;  %v3511_v28 = vor.u32 %v1052_v58, %v1051_v39 }
 0x102   : > { %v568_v49 = vsel %vm558_vm2, nan, %v567_v13  ;;  %v1810_v50 = vsel %vm558_vm2, nan, %v1809_v3  ;;  %v976_v1 = vadd.s32 536870912, %v975_v12  ;;  %v1056_v8 = vor.u32 %v1055_v47, %v1054_v33 }
 0x103   : > { %1494 = vst [vmem:[%s3451_s30 + $0x8] sm:$0xff] %v568_v49  ;;  %v1059_v32 = vor.u32 %v1058_v2, %v1057_v37  ;;  %v1060_v40 = vshll.u32 %v3020_v23, %v1045_v60  ;;  %v1061_v29 = vshrl.u32 %v3021_v27, %v1046_v62  ;;  %vm1063_vm5 = vcmp.lt.s32.totalorder %v3487_v6, 1  ;;  %v229_v37 = vpop.permute.xlu1 %228 }
 0x104   : > { %2742 = vst [vmem:[%s3451_s30 + $0x18] sm:$0xff] %v1810_v50  ;;  %v3522_v24 = vshrl.u32 %v976_v1, 30  ;;  %vm1066_vm6 = vcmp.lt.s32.totalorder %v3487_v6, 4  ;;  %v1071_v34 = vsel %vm1063_vm5, %v1050_v26, %v3511_v28  ;;  %vm1065_vm7 = vcmp.lt.s32.totalorder %v3487_v6, 3 }
 0x105   : > { %v1062_v54 = vor.u32 %v1061_v29, %v1060_v40  ;;  %v1072_v30 = vsel %vm1066_vm6, %v1059_v32, 920167782  ;;  %v3531_v46 = vshll.u32 %v1039_v31, 8  ;;  %vm1064_vm10 = vcmp.lt.s32.totalorder %v3487_v6, 2 }
 0x106   : > { %v978_v59 = vshll.u32 %v3522_v24, 30  ;;  %v1073_v63 = vsel %vm1065_vm7, %v1056_v8, %v1072_v30  ;;  %v1075_v35 = vsel %vm1063_vm5, %v3511_v28, %v1056_v8  ;;  %v1047_v19 = vshrl.u32 %v3016_v5, %v1046_v62 }
 0x107   : > { %v1074_v57 = vsel %vm1064_vm10, %v1071_v34, %v1073_v63  ;;  %v1076_v60 = vsel %vm1066_vm6, %v1062_v54, 1326507024  ;;  %v1080_v9 = vand.u32 65535, %v3531_v46  ;;  %v1081_v39 = vshrl.u32 %v3531_v46, 16 }
 0x108   : > { %v979_v45 = vsub.s32 %v975_v12, %v978_v59  ;;  %v1077_v22 = vsel %vm1065_vm7, %v1059_v32, %v1076_v60  ;;  %v1104_v31 = vand.u32 65535, %v1074_v57  ;;  %v1105_v41 = vshrl.u32 %v1074_v57, 16 }
 0x109   : > { %v1078_v42 = vsel %vm1064_vm10, %v1075_v35, %v1077_v22  ;;  %v971_v18 = vadd.s32 %v3479_v43, %v3468_v4  ;;  %v1067_v53 = vsel %vm1063_vm5, %v1047_v19, %v1050_v26  ;;  %v1068_v2 = vsel %vm1066_vm6, %v1056_v8, 2102212464 }
 0x10a   : > { %vm980_vm8 = vcmp.lt.s32.totalorder %v979_v45, 0  ;;  %v981_v36 = vsub.s32 0, %v979_v45  ;;  %v1082_v33 = vand.u32 65535, %v1078_v42  ;;  %v1083_v38 = vshrl.u32 %v1078_v42, 16 }
 0x10b   : > { %v1107_v10 = vmul.u32 %v1105_v41, %v1080_v9  ;;  %v1108_v58 = vmul.u32 %v1104_v31, %v1081_v39  ;;  %v1106_v13 = vmul.u32 %v1104_v31, %v1080_v9  ;;  %v247_v62 = vmul.f32 %v3104_v20, %v229_v37 }
 0x10c   : > { %v982_v51 = vsel %vm980_vm8, %v981_v36, %v979_v45  ;;  %v1085_v25 = vmul.u32 %v1083_v38, %v1080_v9  ;;  %v1086_v12 = vmul.u32 %v1082_v33, %v1081_v39  ;;  %v1084_v50 = vmul.u32 %v1082_v33, %v1080_v9 }
 0x10d   : > { %v983_v47 = vclz %v982_v51  ;;  %v1110_v3 = vshll.u32 %v1107_v10, 16  ;;  %v1087_v1 = vmul.u32 %v1083_v38, %v1081_v39  ;;  %v1109_v43 = vmul.u32 %v1105_v41, %v1081_v39 }
 0x10e   : > { %v1088_v32 = vshll.u32 %v1085_v25, 16  ;;  %v1090_v4 = vshll.u32 %v1086_v12, 16  ;;  %v1112_v40 = vshll.u32 %v1108_v58, 16  ;;  %v1069_v35 = vsel %vm1065_vm7, %v3511_v28, %v1068_v2 }
 0x10f   : > { %v2848_v49 = vadd.s32 4294967294, %v983_v47  ;;  %vm1114_vm9 = vc.u32 %v1106_v13, %v1110_v3  ;;  %v1116_v54 = vadd.s32 %v1110_v3, %v1106_v13  ;;  %v1111_v22 = vshrl.u32 %v1107_v10, 16 }
 0x110   : > { %vm1092_vm12 = vc.u32 %v1084_v50, %v1088_v32  ;;  %v1094_v26 = vadd.s32 %v1088_v32, %v1084_v50  ;;  %v1115_v29 = vsel %vm1114_vm9, 1, %v3013_v0  ;;  %v1089_v36 = vshrl.u32 %v1085_v25, 16 }
 0x111   : > { %vm2849_vm11 = vcmp.lt.s32.totalorder %v2848_v49, 0  ;;  %v1093_v8 = vsel %vm1092_vm12, 1, %v3013_v0  ;;  %v1117_v30 = vadd.s32 %v1115_v29, %v1109_v43  ;;  %vm1118_vm14 = vc.u32 %v1116_v54, %v1112_v40 }
 0x112   : > { %v986_v34 = vsel %vm2849_vm11, 0, %v2848_v49  ;;  %v1095_v57 = vadd.s32 %v1093_v8, %v1087_v1  ;;  %vm1096_vm13 = vc.u32 %v1094_v26, %v1090_v4  ;;  %v1119_v41 = vsel %vm1118_vm14, 1, %v3013_v0 }
 0x113   : > { %v987_v59 = vsub.s32 32, %v986_v34  ;;  %v991_v63 = vsub.s32 4294967266, %v986_v34  ;;  %v988_v60 = vshll.u32 %v979_v45, %v986_v34  ;;  %v1097_v9 = vsel %vm1096_vm13, 1, %v3013_v0 }
 0x114   : > { %v1099_v39 = vadd.s32 %v1097_v9, %v1095_v57  ;;  %v1121_v33 = vadd.s32 %v1119_v41, %v1117_v30  ;;  %v3566_v19 = vadd.f32 %v247_v62, %v3138_v55  ;;  %v1001_v28 = vsub.s32 4, %v3522_v24 }
 0x115   : > { %v989_v31 = vshrl.u32 %v971_v18, %v987_v59  ;;  %v992_v42 = vadd.s32 127, %v991_v63  ;;  %v248_v45 = vmul.f32 %v3106_v21, %v229_v37  ;;  %v1091_v10 = vshrl.u32 %v1086_v12, 16 }
 0x116   : > { %v1100_v47 = vadd.s32 %v1099_v39, %v1089_v36  ;;  %v1113_v18 = vshrl.u32 %v1108_v58, 16  ;;  %v1122_v2 = vadd.s32 %v1121_v33, %v1111_v22  ;;  %vm879_vm0 = vcmp.lt.s32.totalorder %v3281_v15, 0 }
 0x117   : > { %v990_v38 = vor.u32 %v989_v31, %v988_v60  ;;  %v993_v51 = vshll.u32 %v992_v42, 23  ;;  %v1070_v25 = vsel %vm1064_vm10, %v1067_v53, %v1069_v35  ;;  %v569_v3 = vand.u32 2147483647, %v3566_v19 }
 0x118   : > { %v1101_v55 = vadd.s32 %v1100_v47, %v1091_v10  ;;  %v1120_v62 = vadd.s32 %v1116_v54, %v1112_v40  ;;  %v1123_v49 = vadd.s32 %v1122_v2, %v1113_v18  ;;  %v572_v50 = vand.u32 2139095040, %v3566_v19 }
 0x119   : > { %v994_v13 = vor.u32 4788187, %v993_v51  ;;  %v997_v32 = vcvt.s32.f32 %v990_v38  ;;  %v1002_v37 = vsel %vm879_vm0, %v1001_v28, %v3522_v24  ;;  %v3579_v58 = vadd.f32 %v248_v45, %v3140_v56 }
 0x11a   : > { %vm1126_vm1 = vc.u32 %v1101_v55, %v1120_v62  ;;  %v1127_v12 = vadd.s32 1, %v1123_v49  ;;  %v573_v6 = vshrl.u32 %v572_v50, 23  ;;  %v576_v53 = vand.u32 8388607, %v569_v3 }
 0x11b   : > { %v995_v1 = vand.u32 2147483647, %v994_v13  ;;  %v1124_v43 = vmul.u32 %v3531_v46, %v1070_v25  ;;  %v4190_v40 = vand.u32 2147483647, %v3281_v15  ;;  %v726_v30 = vand.u32 2139095040, %v3579_v58 }
 0x11c   : > { %v1128_v26 = vsel %vm1126_vm1, %v1127_v12, %v1123_v49  ;;  %v2841_v29 = vadd.s32 4294967169, %v573_v6  ;;  %v577_v54 = vor.u32 8388608, %v576_v53  ;;  %v723_v57 = vand.u32 2147483647, %v3579_v58 }
 0x11d   : > { %v998_v4 = vmul.f32 %v997_v32, %v995_v1  ;;  %vm878_vm2 = vcmp.le.f32.partialorder %v4190_v40, 0.7853982  ;;  %v1129_v24 = vadd.s32 %v1128_v26, %v1124_v43  ;;  %vm1033_vm4 = vcmp.lt.s32.totalorder %v3305_v61, 0 }
 0x11e   : > { %v1004_v8 = vsel %vm878_vm2, 0, %v1002_v37  ;;  %v579_v56 = vadd.s32 1, %v2841_v29  ;;  %v4191_v42 = vand.u32 2147483647, %v3305_v61  ;;  %v3602_v36 = vshll.u32 %v577_v54, 8 }
 0x11f   : > { %v999_v34 = vxor.u32 2147483648, %v998_v4  ;;  %v1130_v63 = vadd.s32 536870912, %v1129_v24  ;;  %v2265_v46 = vadd.s32 3, %v1004_v8  ;;  %v727_v39 = vshrl.u32 %v726_v30, 23 }
 0x120   : > { %vm580_vm3 = vcmp.gt.s32.totalorder %v579_v56, 0  ;;  %vm3598_vm15 = vcmp.le.f32.partialorder %v4191_v42, 0.7853982  ;;  %v3604_v45 = vand.u32 3, %v1004_v8  ;;  %v3610_v18 = vand.u32 8388607, %v723_v57 }
 0x121   : > { %v1000_v59 = vsel %vm879_vm0, %v999_v34, %v998_v4  ;;  %v1131_v22 = vshrl.u32 %v1130_v63, 30  ;;  %v581_v31 = vsel %vm580_vm3, %v579_v56, 0  ;;  %v3606_v10 = vand.u32 3, %v2265_v46 }
 0x122   : > { %v3590_v35 = vsel %vm878_vm2, %v3281_v15, %v1000_v59  ;;  %v583_v41 = vand.u32 31, %v581_v31  ;;  %v1125_v50 = vadd.s32 %v1120_v62, %v1101_v55  ;;  %v3617_v1 = vand.u32 65535, %v3602_v36 }
 0x123   : > { %v1005_v60 = vmul.f32 %v3590_v35, %v3590_v35  ;;  %v1132_v51 = vshll.u32 %v1131_v22, 30  ;;  %v1155_v28 = vsub.s32 4, %v1131_v22  ;;  %v3620_v32 = vshrl.u32 %v3602_v36, 16 }
 0x124   : > { %v584_v47 = vsub.s32 32, %v583_v41  ;;  %v2844_v37 = vadd.s32 4294967169, %v727_v39  ;;  %vm1026_vm6 = vcmp.eq.s32.totalorder %v3604_v45, 2  ;;  %v3629_v55 = vshrl.u32 %v581_v31, 5 }
 0x125   : > { %v1006_v33 = vmul.f32 -0.001358992, %v1005_v60  ;;  %v1013_v38 = vmul.f32 -0.00019511016, %v1005_v60  ;;  %v3612_v25 = vsub.s32 %v1129_v24, %v1132_v51  ;;  %v1156_v49 = vsel %vm1033_vm4, %v1155_v28, %v1131_v22 }
 0x126   : > { %v3627_v4 = vsel %vm3598_vm15, 0, %v1156_v49  ;;  %v587_v62 = vshrl.u32 %v3017_v7, %v584_v47  ;;  %v731_v43 = vor.u32 8388608, %v3610_v18  ;;  %vm2271_vm7 = vcmp.eq.s32.totalorder %v3606_v10, 2 }
 0x127   : > { %v1007_v2 = vadd.f32 0.041655596, %v1006_v33  ;;  %v1014_v13 = vadd.f32 0.008332121, %v1013_v38  ;;  %vm1134_vm5 = vcmp.lt.s32.totalorder %v3612_v25, 0  ;;  %v1135_v53 = vsub.s32 0, %v3612_v25 }
 0x128   : > { %v590_v34 = vshrl.u32 %v3018_v11, %v584_v47  ;;  %vm1023_vm10 = vcmp.eq.s32.totalorder %v3604_v45, 0  ;;  %vm2268_vm8 = vcmp.eq.s32.totalorder %v3606_v10, 0  ;;  %v586_v24 = vshll.u32 %v3016_v5, %v583_v41 }
 0x129   : > { %v1008_v12 = vmul.f32 %v1007_v2, %v1005_v60  ;;  %v1015_v6 = vmul.f32 %v1014_v13, %v1005_v60  ;;  %v1136_v29 = vsel %vm1134_vm5, %v1135_v53, %v3612_v25  ;;  %v593_v54 = vshrl.u32 %v3019_v14, %v584_v47 }
 0x12a   : > { %v1137_v8 = vclz %v1136_v29  ;;  %v3640_v56 = vadd.s32 1, %v2844_v37  ;;  %vm1022_vm9 = vcmp.lt.s32.totalorder %v3604_v45, 2  ;;  %vm2267_vm11 = vcmp.lt.s32.totalorder %v3606_v10, 2 }
 0x12b   : > { %v1009_v40 = vadd.f32 -0.4999988, %v1008_v12  ;;  %v1016_v26 = vadd.f32 -0.16666654, %v1015_v6  ;;  %v589_v63 = vshll.u32 %v3017_v7, %v583_v41  ;;  %v592_v46 = vshll.u32 %v3018_v11, %v583_v41 }
 0x12c   : > { %vm1020_vm12 = vweird.f32 %v3281_v15  ;;  %v2851_v22 = vadd.s32 4294967294, %v1137_v8  ;;  %v2420_v31 = vadd.s32 3, %v3627_v4  ;;  %v585_v42 = vshrl.u32 %v3016_v5, %v584_v47 }
 0x12d   : > { %v1010_v30 = vmul.f32 %v1009_v40, %v1005_v60  ;;  %v1017_v59 = vmul.f32 %v1016_v26, %v1005_v60  ;;  %v596_v39 = vshrl.u32 %v3020_v23, %v584_v47  ;;  %v588_v60 = vor.u32 %v587_v62, %v586_v24 }
 0x12e   : > { %v591_v51 = vor.u32 %v590_v34, %v589_v63  ;;  %vm2852_vm13 = vcmp.lt.s32.totalorder %v2851_v22, 0  ;;  %v594_v28 = vor.u32 %v593_v54, %v592_v46  ;;  %v595_v2 = vshll.u32 %v3019_v14, %v583_v41 }
 0x12f   : > { %v1011_v33 = vadd.f32 1.0, %v1010_v30  ;;  %v1018_v38 = vadd.f32 1.0, %v1017_v59  ;;  %v599_v13 = vshrl.u32 %v3021_v27, %v584_v47  ;;  %v1140_v12 = vsel %vm2852_vm13, 0, %v2851_v22 }
 0x130   : > { %v598_v6 = vshll.u32 %v3020_v23, %v583_v41  ;;  %v1141_v53 = vsub.s32 32, %v1140_v12  ;;  %v1145_v40 = vsub.s32 4294967266, %v1140_v12  ;;  %v597_v26 = vor.u32 %v596_v39, %v595_v2 }
 0x131   : > { %v1019_v49 = vmul.f32 %v1018_v38, %v3590_v35  ;;  %v1027_v37 = vxor.u32 2147483648, %v1011_v33  ;;  %vm601_vm14 = vcmp.lt.s32.totalorder %v3629_v55, 1  ;;  %v1142_v34 = vshll.u32 %v3612_v25, %v1140_v12 }
 0x132   : > { %v600_v8 = vor.u32 %v599_v13, %v598_v6  ;;  %v1143_v24 = vshrl.u32 %v1125_v50, %v1141_v53  ;;  %v1146_v47 = vadd.s32 127, %v1145_v40  ;;  %vm604_vm0 = vcmp.lt.s32.totalorder %v3629_v55, 4 }
 0x133   : > { %v1024_v29 = vxor.u32 2147483648, %v1019_v49  ;;  %v1028_v62 = vsel %vm1026_vm6, %v1027_v37, %v1019_v49  ;;  %v2273_v35 = vsel %vm2271_vm7, %v1027_v37, %v1019_v49  ;;  %vm602_vm1 = vcmp.lt.s32.totalorder %v3629_v55, 2 }
 0x134   : > { %v606_v25 = vsel %vm604_vm0, %v594_v28, 2102212464  ;;  %v1144_v30 = vor.u32 %v1143_v24, %v1142_v34  ;;  %v1147_v59 = vshll.u32 %v1146_v47, 23  ;;  %vm603_vm2 = vcmp.lt.s32.totalorder %v3629_v55, 3 }
 0x135   : > { %v1025_v41 = vsel %vm1023_vm10, %v1011_v33, %v1024_v29  ;;  %v2270_v54 = vsel %vm2268_vm8, %v1011_v33, %v1024_v29  ;;  %v609_v39 = vsel %vm601_vm14, %v588_v60, %v591_v51  ;;  %v605_v45 = vsel %vm601_vm14, %v585_v42, %v588_v60 }
 0x136   : > { %v1029_v50 = vsel %vm1022_vm9, %v1025_v41, %v1028_v62  ;;  %v2274_v63 = vsel %vm2267_vm11, %v2270_v54, %v2273_v35  ;;  %v1148_v33 = vor.u32 4788187, %v1147_v59  ;;  %v607_v38 = vsel %vm603_vm2, %v591_v51, %v606_v25 }
 0x137   : > { %v1030_v46 = vsel %vm1020_vm12, nan, %v1029_v50  ;;  %v2275_v22 = vsel %vm1020_vm12, nan, %v2274_v63  ;;  %v610_v10 = vsel %vm604_vm0, %v597_v26, 920167782  ;;  %v1151_v2 = vcvt.s32.f32 %v1144_v30 }
 0x138   : > { %1497 = vst [vmem:[%s3451_s30 + $0x40] sm:$0xff] %v1030_v46  ;;  %v611_v13 = vsel %vm603_vm2, %v594_v28, %v610_v10  ;;  %v613_v15 = vsel %vm601_vm14, %v591_v51, %v594_v28  ;;  %v614_v49 = vsel %vm604_vm0, %v600_v8, 1326507024  ;;  %v1149_v37 = vand.u32 2147483647, %v1148_v33 }
 0x139   : > { %2745 = vst [vmem:[%s3451_s30 + $0x50] sm:$0xff] %v2275_v22  ;;  %v612_v12 = vsel %vm602_vm1, %v609_v39, %v611_v13  ;;  %v615_v6 = vsel %vm603_vm2, %v597_v26, %v614_v49  ;;  %vm734_vm3 = vcmp.gt.s32.totalorder %v3640_v56, 0  ;;  %v3694_v42 = vsel %vm602_vm1, %v605_v45, %v607_v38 }
 0x13a   : > { %v616_v60 = vsel %vm602_vm1, %v613_v15, %v615_v6  ;;  %v642_v53 = vand.u32 65535, %v612_v12  ;;  %v643_v40 = vshrl.u32 %v612_v12, 16  ;;  %v1152_v51 = vmul.f32 %v1151_v2, %v1149_v37 }
 0x13b   : > { %v620_v28 = vand.u32 65535, %v616_v60  ;;  %v621_v29 = vshrl.u32 %v616_v60, 16  ;;  %v735_v62 = vsel %vm734_vm3, %v3640_v56, 0  ;;  %v3700_v34 = vand.u32 3, %v3627_v4 }
 0x13c   : > { %v3702_v26 = vand.u32 3, %v2420_v31  ;;  %v645_v8 = vmul.u32 %v643_v40, %v3617_v1  ;;  %v646_v24 = vmul.u32 %v642_v53, %v3620_v32  ;;  %v1153_v47 = vxor.u32 2147483648, %v1152_v51 }
 0x13d   : > { %v623_v55 = vmul.u32 %v621_v29, %v3617_v1  ;;  %v624_v35 = vmul.u32 %v620_v28, %v3620_v32  ;;  %v662_v41 = vmul.u32 %v3602_v36, %v3694_v42  ;;  %v644_v54 = vmul.u32 %v642_v53, %v3617_v1 }
 0x13e   : > { %v647_v56 = vmul.u32 %v643_v40, %v3620_v32  ;;  %v648_v4 = vshll.u32 %v645_v8, 16  ;;  %v3712_v25 = vshrl.u32 %v735_v62, 5  ;;  %v1154_v31 = vsel %vm1033_vm4, %v1153_v47, %v1152_v51 }
 0x13f   : > { %v622_v50 = vmul.u32 %v620_v28, %v3617_v1  ;;  %v625_v30 = vmul.u32 %v621_v29, %v3620_v32  ;;  %v626_v59 = vshll.u32 %v623_v55, 16  ;;  %v3721_v63 = vsel %vm3598_vm15, %v3305_v61, %v1154_v31 }
 0x140   : > { %v628_v46 = vshll.u32 %v624_v35, 16  ;;  %v650_v22 = vshll.u32 %v646_v24, 16  ;;  %vm652_vm5 = vc.u32 %v644_v54, %v648_v4  ;;  %v1159_v39 = vmul.f32 %v3721_v63, %v3721_v63 }
 0x141   : > { %vm630_vm6 = vc.u32 %v622_v50, %v626_v59  ;;  %v632_v33 = vadd.s32 %v626_v59, %v622_v50  ;;  %v653_v45 = vsel %vm652_vm5, 1, %v3013_v0  ;;  %v654_v38 = vadd.s32 %v648_v4, %v644_v54 }
 0x142   : > { %v631_v1 = vsel %vm630_vm6, 1, %v3013_v0  ;;  %v655_v32 = vadd.s32 %v653_v45, %v647_v56  ;;  %v737_v10 = vand.u32 31, %v735_v62  ;;  %v1160_v2 = vmul.f32 -0.001358992, %v1159_v39 }
 0x143   : > { %v1167_v13 = vmul.f32 -0.00019511016, %v1159_v39  ;;  %v633_v9 = vadd.s32 %v631_v1, %v625_v30  ;;  %vm634_vm4 = vc.u32 %v632_v33, %v628_v46  ;;  %v627_v15 = vshrl.u32 %v623_v55, 16 }
 0x144   : > { %v635_v49 = vsel %vm634_vm4, 1, %v3013_v0  ;;  %vm656_vm15 = vc.u32 %v654_v38, %v650_v22  ;;  %v3728_v37 = vsub.s32 32, %v737_v10  ;;  %v1161_v12 = vadd.f32 0.041655596, %v1160_v2 }
 0x145   : > { %v1168_v6 = vadd.f32 0.008332121, %v1167_v13  ;;  %v637_v60 = vadd.s32 %v635_v49, %v633_v9  ;;  %v657_v53 = vsel %vm656_vm15, 1, %v3013_v0  ;;  %v629_v40 = vshrl.u32 %v624_v35, 16 }
 0x146   : > { %v649_v51 = vshrl.u32 %v645_v8, 16  ;;  %v651_v28 = vshrl.u32 %v646_v24, 16  ;;  %v659_v29 = vadd.s32 %v657_v53, %v655_v32  ;;  %v1162_v62 = vmul.f32 %v1161_v12, %v1159_v39 }
 0x147   : > { %v1169_v47 = vmul.f32 %v1168_v6, %v1159_v39  ;;  %v638_v54 = vadd.s32 %v637_v60, %v627_v15  ;;  %v741_v55 = vshrl.u32 %v3017_v7, %v3728_v37  ;;  %v3733_v56 = vadd.s32 %v654_v38, %v650_v22 }
 0x148   : > { %v660_v4 = vadd.s32 %v659_v29, %v649_v51  ;;  %v740_v31 = vshll.u32 %v3016_v5, %v737_v10  ;;  %v744_v50 = vshrl.u32 %v3018_v11, %v3728_v37  ;;  %v1163_v30 = vadd.f32 -0.4999988, %v1162_v62 }
 0x149   : > { %v1170_v59 = vadd.f32 -0.16666654, %v1169_v47  ;;  %vm1180_vm7 = vcmp.eq.s32.totalorder %v3700_v34, 2  ;;  %v3739_v8 = vadd.s32 %v638_v54, %v629_v40  ;;  %v743_v24 = vshll.u32 %v3017_v7, %v737_v10 }
 0x14a   : > { %vm1177_vm10 = vcmp.eq.s32.totalorder %v3700_v34, 0  ;;  %v661_v35 = vadd.s32 %v660_v4, %v651_v28  ;;  %v747_v46 = vshrl.u32 %v3019_v14, %v3728_v37  ;;  %v749_v22 = vshll.u32 %v3019_v14, %v737_v10 }
 0x14b   : > { %v750_v33 = vshrl.u32 %v3020_v23, %v3728_v37  ;;  %v1164_v45 = vmul.f32 %v1163_v30, %v1159_v39  ;;  %v1171_v1 = vmul.f32 %v1170_v59, %v1159_v39  ;;  %vm1176_vm8 = vcmp.lt.s32.totalorder %v3700_v34, 2 }
 0x14c   : > { %vm664_vm9 = vc.u32 %v3739_v8, %v3733_v56  ;;  %v3751_v38 = vor.u32 %v741_v55, %v740_v31  ;;  %v665_v32 = vadd.s32 1, %v661_v35  ;;  %v3753_v2 = vor.u32 %v744_v50, %v743_v24 }
 0x14d   : > { %v746_v13 = vshll.u32 %v3018_v11, %v737_v10  ;;  %v751_v9 = vor.u32 %v750_v33, %v749_v22  ;;  %v1165_v15 = vadd.f32 1.0, %v1164_v45  ;;  %v1172_v49 = vadd.f32 1.0, %v1171_v1 }
 0x14e   : > { %v752_v12 = vshll.u32 %v3020_v23, %v737_v10  ;;  %v753_v39 = vshrl.u32 %v3021_v27, %v3728_v37  ;;  %vm2422_vm11 = vcmp.lt.s32.totalorder %v3702_v26, 2  ;;  %v666_v6 = vsel %vm664_vm9, %v665_v32, %v661_v35 }
 0x14f   : > { %v748_v60 = vor.u32 %v747_v46, %v746_v13  ;;  %vm758_vm12 = vcmp.lt.s32.totalorder %v3712_v25, 4  ;;  %v1173_v53 = vmul.f32 %v1172_v49, %v3721_v63  ;;  %v1181_v40 = vxor.u32 2147483648, %v1165_v15 }
 0x150   : > { %v667_v51 = vadd.s32 %v666_v6, %v662_v41  ;;  %v754_v28 = vor.u32 %v753_v39, %v752_v12  ;;  %vm2423_vm13 = vcmp.eq.s32.totalorder %v3702_v26, 0  ;;  %vm2426_vm14 = vcmp.eq.s32.totalorder %v3702_v26, 2 }
 0x151   : > { %vm755_vm0 = vcmp.lt.s32.totalorder %v3712_v25, 1  ;;  %v764_v10 = vsel %vm758_vm12, %v751_v9, 920167782  ;;  %v1178_v29 = vxor.u32 2147483648, %v1173_v53  ;;  %vm757_vm1 = vcmp.lt.s32.totalorder %v3712_v25, 3 }
 0x152   : > { %v668_v62 = vadd.s32 536870912, %v667_v51  ;;  %v763_v36 = vsel %vm755_vm0, %v3751_v38, %v3753_v2  ;;  %v1182_v42 = vsel %vm1180_vm7, %v1181_v40, %v1173_v53  ;;  %v2428_v41 = vsel %vm2426_vm14, %v1181_v40, %v1173_v53 }
 0x153   : > { %v765_v63 = vsel %vm757_vm1, %v748_v60, %v764_v10  ;;  %v768_v47 = vsel %vm758_vm12, %v754_v28, 1326507024  ;;  %v1179_v54 = vsel %vm1177_vm10, %v1165_v15, %v1178_v29  ;;  %v2425_v55 = vsel %vm2423_vm13, %v1165_v15, %v1178_v29 }
 0x154   : > { %v3783_v4 = vshrl.u32 %v668_v62, 30  ;;  %v767_v31 = vsel %vm755_vm0, %v3753_v2, %v748_v60  ;;  %vm1174_vm2 = vweird.f32 %v3305_v61  ;;  %v1183_v50 = vsel %vm1176_vm8, %v1179_v54, %v1182_v42 }
 0x155   : > { %v2429_v30 = vsel %vm2422_vm11, %v2425_v55, %v2428_v41  ;;  %v769_v59 = vsel %vm757_vm1, %v751_v9, %v768_v47  ;;  %v1184_v24 = vsel %vm1174_vm2, nan, %v1183_v50  ;;  %vm756_vm3 = vcmp.lt.s32.totalorder %v3712_v25, 2  ;;  %v237_v47 = vpop.permute.xlu0 %236 }
 0x156   : > { %v2430_v35 = vsel %vm1174_vm2, nan, %v2429_v30  ;;  %v670_v46 = vshll.u32 %v3783_v4, 30  ;;  %1498 = vst [vmem:[%s3451_s30 + $0x48] sm:$0xff] %v1184_v24  ;;  %v766_v22 = vsel %vm756_vm3, %v763_v36, %v765_v63  ;;  %v770_v61 = vsel %vm756_vm3, %v767_v31, %v769_v59 }
 0x157   : > { %v3804_v34 = vshll.u32 %v731_v43, 8  ;;  %v213_v26 = vmul.f32 %v3096_v16, %v3509_v52  ;;  %2746 = vst [vmem:[%s3451_s30 + $0x58] sm:$0xff] %v2430_v35  ;;  %v774_v45 = vand.u32 65535, %v770_v61  ;;  %v775_v1 = vshrl.u32 %v770_v61, 16 }
 0x158   : > { %v671_v33 = vsub.s32 %v667_v51, %v670_v46  ;;  %v796_v15 = vand.u32 65535, %v766_v22  ;;  %v797_v49 = vshrl.u32 %v766_v22, 16  ;;  %v739_v18 = vshrl.u32 %v3016_v5, %v3728_v37 }
 0x159   : > { %v772_v32 = vand.u32 65535, %v3804_v34  ;;  %v773_v13 = vshrl.u32 %v3804_v34, 16  ;;  %v760_v43 = vsel %vm758_vm12, %v748_v60, 2102212464  ;;  %v214_v39 = vmul.f32 %v3098_v17, %v3509_v52 }
 0x15a   : > { %vm672_vm5 = vcmp.lt.s32.totalorder %v671_v33, 0  ;;  %v673_v9 = vsub.s32 0, %v671_v33  ;;  %v221_v6 = vadd.f32 %v213_v26, %v3128_v44  ;;  %v663_v53 = vadd.s32 %v3733_v56, %v3739_v8 }
 0x15b   : > { %v777_v12 = vmul.u32 %v775_v1, %v772_v32  ;;  %v778_v16 = vmul.u32 %v774_v45, %v773_v13  ;;  %v759_v28 = vsel %vm755_vm0, %v739_v18, %v3751_v38  ;;  %v776_v37 = vmul.u32 %v774_v45, %v772_v32 }
 0x15c   : > { %v674_v40 = vsel %vm672_vm5, %v673_v9, %v671_v33  ;;  %v761_v60 = vsel %vm757_vm1, %v3753_v2, %v760_v43  ;;  %v779_v29 = vmul.u32 %v775_v1, %v773_v13  ;;  %v799_v62 = vmul.u32 %v797_v49, %v772_v32 }
 0x15d   : > { %v675_v51 = vclz %v674_v40  ;;  %v780_v10 = vshll.u32 %v777_v12, 16  ;;  %v800_v17 = vmul.u32 %v796_v15, %v773_v13  ;;  %v782_v44 = vshll.u32 %v778_v16, 16 }
 0x15e   : > { %v781_v56 = vshrl.u32 %v777_v12, 16  ;;  %v798_v42 = vmul.u32 %v796_v15, %v772_v32  ;;  %v802_v41 = vshll.u32 %v799_v62, 16  ;;  %v801_v59 = vmul.u32 %v797_v49, %v773_v13 }
 0x15f   : > { %v2842_v52 = vadd.s32 4294967294, %v675_v51  ;;  %vm784_vm6 = vc.u32 %v776_v37, %v780_v10  ;;  %v786_v36 = vadd.s32 %v780_v10, %v776_v37  ;;  %v804_v63 = vshll.u32 %v800_v17, 16 }
 0x160   : > { %v785_v8 = vsel %vm784_vm6, 1, %v3013_v0  ;;  %vm806_vm7 = vc.u32 %v798_v42, %v802_v41  ;;  %v808_v55 = vadd.s32 %v802_v41, %v798_v42  ;;  %v251_v46 = vmul.f32 %v3104_v20, %v237_v47 }
 0x161   : > { %vm2843_vm4 = vcmp.lt.s32.totalorder %v2842_v52, 0  ;;  %v787_v38 = vadd.s32 %v785_v8, %v779_v29  ;;  %vm788_vm15 = vc.u32 %v786_v36, %v782_v44  ;;  %v807_v35 = vsel %vm806_vm7, 1, %v3013_v0 }
 0x162   : > { %v678_v54 = vsel %vm2843_vm4, 0, %v2842_v52  ;;  %v789_v2 = vsel %vm788_vm15, 1, %v3013_v0  ;;  %vm810_vm10 = vc.u32 %v808_v55, %v804_v63  ;;  %v809_v45 = vadd.s32 %v807_v35, %v801_v59 }
 0x163   : > { %v679_v31 = vsub.s32 32, %v678_v54  ;;  %v683_v50 = vsub.s32 4294967266, %v678_v54  ;;  %v791_v30 = vadd.s32 %v789_v2, %v787_v38  ;;  %v680_v24 = vshll.u32 %v671_v33, %v678_v54 }
 0x164   : > { %v783_v1 = vshrl.u32 %v778_v16, 16  ;;  %v803_v32 = vshrl.u32 %v799_v62, 16  ;;  %v811_v9 = vsel %vm810_vm10, 1, %v3013_v0  ;;  %v3831_v15 = vadd.f32 %v251_v46, %v221_v6 }
 0x165   : > { %v681_v22 = vshrl.u32 %v663_v53, %v679_v31  ;;  %v684_v61 = vadd.s32 127, %v683_v50  ;;  %v792_v26 = vadd.s32 %v791_v30, %v781_v56  ;;  %v813_v12 = vadd.s32 %v811_v9, %v809_v45 }
 0x166   : > { %v252_v33 = vmul.f32 %v3106_v21, %v237_v47  ;;  %v222_v13 = vadd.f32 %v214_v39, %v3134_v48  ;;  %v1188_v20 = vand.u32 2139095040, %v3831_v15  ;;  %v805_v40 = vshrl.u32 %v800_v17, 16 }
 0x167   : > { %v682_v18 = vor.u32 %v681_v22, %v680_v24  ;;  %v685_v43 = vshll.u32 %v684_v61, 23  ;;  %v793_v49 = vadd.s32 %v792_v26, %v783_v1  ;;  %v814_v51 = vadd.s32 %v813_v12, %v803_v32 }
 0x168   : > { %v1185_v16 = vand.u32 2147483647, %v3831_v15  ;;  %v693_v37 = vsub.s32 4, %v3783_v4  ;;  %v762_v6 = vsel %vm756_vm3, %v759_v28, %v761_v60  ;;  %v812_v10 = vadd.s32 %v808_v55, %v804_v63 }
 0x169   : > { %v686_v53 = vor.u32 4788187, %v685_v43  ;;  %v1189_v29 = vshrl.u32 %v1188_v20, 23  ;;  %v689_v52 = vcvt.s32.f32 %v682_v18  ;;  %v815_v21 = vadd.s32 %v814_v51, %v805_v40 }
 0x16a   : > { %v3840_v44 = vadd.f32 %v252_v33, %v222_v13  ;;  %vm818_vm8 = vc.u32 %v793_v49, %v812_v10  ;;  %vm571_vm9 = vcmp.lt.s32.totalorder %v3566_v19, 0  ;;  %v1192_v36 = vand.u32 8388607, %v1185_v16 }
 0x16b   : > { %v687_v62 = vand.u32 2147483647, %v686_v53  ;;  %v2853_v48 = vadd.s32 4294967169, %v1189_v29  ;;  %v819_v17 = vadd.s32 1, %v815_v21  ;;  %v694_v56 = vsel %vm571_vm9, %v693_v37, %v3783_v4 }
 0x16c   : > { %v816_v25 = vmul.u32 %v3804_v34, %v762_v6  ;;  %v1342_v42 = vand.u32 2139095040, %v3840_v44  ;;  %vm570_vm11 = vcmp.le.f32.partialorder %v569_v3, 0.7853982  ;;  %v1193_v47 = vor.u32 8388608, %v1192_v36 }
 0x16d   : > { %v690_v39 = vmul.f32 %v689_v52, %v687_v62  ;;  %v1195_v28 = vadd.s32 1, %v2853_v48  ;;  %v820_v8 = vsel %vm818_vm8, %v819_v17, %v815_v21  ;;  %v696_v63 = vsel %vm570_vm11, 0, %v694_v56 }
 0x16e   : > { %v821_v41 = vadd.s32 %v820_v8, %v816_v25  ;;  %v1339_v4 = vand.u32 2147483647, %v3840_v44  ;;  %v1343_v31 = vshrl.u32 %v1342_v42, 23  ;;  %v1955_v35 = vadd.s32 3, %v696_v63 }
 0x16f   : > { %v691_v60 = vxor.u32 2147483648, %v690_v39  ;;  %vm1196_vm12 = vcmp.gt.s32.totalorder %v1195_v28, 0  ;;  %v3852_v46 = vshll.u32 %v1193_v47, 8  ;;  %v3858_v45 = vand.u32 3, %v696_v63 }
 0x170   : > { %v822_v2 = vadd.s32 536870912, %v821_v41  ;;  %v1197_v55 = vsel %vm1196_vm12, %v1195_v28, 0  ;;  %v3856_v22 = vand.u32 8388607, %v1339_v4  ;;  %v2856_v1 = vadd.s32 4294967169, %v1343_v31 }
 0x171   : > { %v692_v38 = vsel %vm571_vm9, %v691_v60, %v690_v39  ;;  %v1199_v30 = vand.u32 31, %v1197_v55  ;;  %v817_v32 = vadd.s32 %v812_v10, %v793_v49  ;;  %vm725_vm13 = vcmp.lt.s32.totalorder %v3579_v58, 0 }
 0x172   : > { %v695_v54 = vsel %vm570_vm11, %v3566_v19, %v692_v38  ;;  %v823_v50 = vshrl.u32 %v822_v2, 30  ;;  %v3865_v33 = vand.u32 3, %v1955_v35  ;;  %v3868_v13 = vand.u32 65535, %v3852_v46 }
 0x173   : > { %v697_v34 = vmul.f32 %v695_v54, %v695_v54  ;;  %v3862_v18 = vsub.s32 32, %v1199_v30  ;;  %v3872_v53 = vshrl.u32 %v1197_v55, 5  ;;  %v3875_v49 = vshrl.u32 %v3852_v46, 16 }
 0x174   : > { %v824_v3 = vshll.u32 %v823_v50, 30  ;;  %vm718_vm0 = vcmp.eq.s32.totalorder %v3858_v45, 2  ;;  %v1347_v37 = vor.u32 8388608, %v3856_v22  ;;  %v3879_v6 = vadd.s32 1, %v2856_v1 }
 0x175   : > { %v698_v59 = vmul.f32 -0.001358992, %v697_v34  ;;  %v705_v24 = vmul.f32 -0.00019511016, %v697_v34  ;;  %vm715_vm1 = vcmp.eq.s32.totalorder %v3858_v45, 0  ;;  %v1202_v29 = vshll.u32 %v3016_v5, %v1199_v30 }
 0x176   : > { %v3860_v9 = vsub.s32 %v821_v41, %v824_v3  ;;  %v1203_v62 = vshrl.u32 %v3017_v7, %v3862_v18  ;;  %v1206_v52 = vshrl.u32 %v3018_v11, %v3862_v18  ;;  %vm714_vm2 = vcmp.lt.s32.totalorder %v3858_v45, 2 }
 0x177   : > { %v699_v61 = vadd.f32 0.041655596, %v698_v59  ;;  %v706_v26 = vadd.f32 0.008332121, %v705_v24  ;;  %v847_v17 = vsub.s32 4, %v823_v50  ;;  %vm712_vm3 = vweird.f32 %v3566_v19 }
 0x178   : > { %vm826_vm14 = vcmp.lt.s32.totalorder %v3860_v9, 0  ;;  %v827_v20 = vsub.s32 0, %v3860_v9  ;;  %v1205_v36 = vshll.u32 %v3017_v7, %v1199_v30  ;;  %v1209_v56 = vshrl.u32 %v3019_v14, %v3862_v18 }
 0x179   : > { %v700_v43 = vmul.f32 %v699_v61, %v697_v34  ;;  %v707_v12 = vmul.f32 %v706_v26, %v697_v34  ;;  %v1212_v25 = vshrl.u32 %v3020_v23, %v3862_v18  ;;  %v1215_v28 = vshrl.u32 %v3021_v27, %v3862_v18 }
 0x17a   : > { %v828_v10 = vsel %vm826_vm14, %v827_v20, %v3860_v9  ;;  %v1211_v41 = vshll.u32 %v3019_v14, %v1199_v30  ;;  %vm3900_vm5 = vcmp.le.f32.partialorder %v723_v57, 0.7853982  ;;  %vm1958_vm6 = vcmp.eq.s32.totalorder %v3865_v33, 0 }
 0x17b   : > { %v701_v40 = vadd.f32 -0.4999988, %v700_v43  ;;  %v708_v51 = vadd.f32 -0.16666654, %v707_v12  ;;  %v829_v39 = vclz %v828_v10  ;;  %vm1961_vm4 = vcmp.eq.s32.totalorder %v3865_v33, 2 }
 0x17c   : > { %v1204_v63 = vor.u32 %v1203_v62, %v1202_v29  ;;  %v3906_v47 = vor.u32 %v1206_v52, %v1205_v36  ;;  %v1208_v2 = vshll.u32 %v3018_v11, %v1199_v30  ;;  %v1214_v55 = vshll.u32 %v3020_v23, %v1199_v30 }
 0x17d   : > { %v702_v21 = vmul.f32 %v701_v40, %v697_v34  ;;  %v709_v48 = vmul.f32 %v708_v51, %v697_v34  ;;  %v2845_v42 = vadd.s32 4294967294, %v829_v39  ;;  %vm1957_vm7 = vcmp.lt.s32.totalorder %v3865_v33, 2 }
 0x17e   : > { %v1213_v57 = vor.u32 %v1212_v25, %v1211_v41  ;;  %v848_v24 = vsel %vm725_vm13, %v847_v17, %v823_v50  ;;  %v1210_v35 = vor.u32 %v1209_v56, %v1208_v2  ;;  %v1216_v3 = vor.u32 %v1215_v28, %v1214_v55 }
 0x17f   : > { %v703_v60 = vadd.f32 1.0, %v702_v21  ;;  %v710_v8 = vadd.f32 1.0, %v709_v48  ;;  %vm2846_vm15 = vcmp.lt.s32.totalorder %v2845_v42, 0  ;;  %vm1217_vm10 = vcmp.lt.s32.totalorder %v3872_v53, 1 }
 0x180   : > { %v832_v59 = vsel %vm2846_vm15, 0, %v2845_v42  ;;  %vm1219_vm8 = vcmp.lt.s32.totalorder %v3872_v53, 3  ;;  %vm1220_vm9 = vcmp.lt.s32.totalorder %v3872_v53, 4  ;;  %v1225_v1 = vsel %vm1217_vm10, %v1204_v63, %v3906_v47 }
 0x181   : > { %v711_v34 = vmul.f32 %v710_v8, %v695_v54  ;;  %v719_v31 = vxor.u32 2147483648, %v703_v60  ;;  %v833_v26 = vsub.s32 32, %v832_v59  ;;  %v837_v30 = vsub.s32 4294967266, %v832_v59 }
 0x182   : > { %v834_v43 = vshll.u32 %v3860_v9, %v832_v59  ;;  %v1226_v20 = vsel %vm1220_vm9, %v1213_v57, 920167782  ;;  %vm1218_vm11 = vcmp.lt.s32.totalorder %v3872_v53, 2  ;;  %v1230_v45 = vsel %vm1220_vm9, %v1216_v3, 1326507024 }
 0x183   : > { %v716_v61 = vxor.u32 2147483648, %v711_v34  ;;  %v720_v54 = vsel %vm718_vm0, %v719_v31, %v711_v34  ;;  %v835_v12 = vshrl.u32 %v817_v32, %v833_v26  ;;  %v838_v51 = vadd.s32 127, %v837_v30 }
 0x184   : > { %v1227_v10 = vsel %vm1219_vm8, %v1210_v35, %v1226_v20  ;;  %v1229_v32 = vsel %vm1217_vm10, %v3906_v47, %v1210_v35  ;;  %v850_v39 = vsel %vm3900_vm5, 0, %v848_v24  ;;  %v1963_v36 = vsel %vm1961_vm4, %v719_v31, %v711_v34 }
 0x185   : > { %v717_v50 = vsel %vm715_vm1, %v703_v60, %v716_v61  ;;  %v836_v62 = vor.u32 %v835_v12, %v834_v43  ;;  %v1228_v9 = vsel %vm1218_vm11, %v1225_v1, %v1227_v10  ;;  %v839_v52 = vshll.u32 %v838_v51, 23 }
 0x186   : > { %v721_v40 = vsel %vm714_vm2, %v717_v50, %v720_v54  ;;  %v1258_v21 = vand.u32 65535, %v1228_v9  ;;  %v1259_v48 = vshrl.u32 %v1228_v9, 16  ;;  %v1960_v17 = vsel %vm1958_vm6, %v703_v60, %v716_v61 }
 0x187   : > { %v722_v29 = vsel %vm712_vm3, nan, %v721_v40  ;;  %v1231_v56 = vsel %vm1219_vm8, %v1213_v57, %v1230_v45  ;;  %v840_v25 = vor.u32 4788187, %v839_v52  ;;  %v1964_v28 = vsel %vm1957_vm7, %v1960_v17, %v1963_v36 }
 0x188   : > { %1495 = vst [vmem:[%s3451_s30 + $0x20] sm:$0xff] %v722_v29  ;;  %v1201_v8 = vshrl.u32 %v3016_v5, %v3862_v18  ;;  %v1232_v42 = vsel %vm1218_vm11, %v1229_v32, %v1231_v56  ;;  %v1965_v41 = vsel %vm712_vm3, nan, %v1964_v28  ;;  %v1261_v55 = vmul.u32 %v1259_v48, %v3868_v13 }
 0x189   : > { %v1236_v60 = vand.u32 65535, %v1232_v42  ;;  %v1237_v2 = vshrl.u32 %v1232_v42, 16  ;;  %v841_v34 = vand.u32 2147483647, %v840_v25  ;;  %v843_v31 = vcvt.s32.f32 %v836_v62  ;;  %2743 = vst [vmem:[%s3451_s30 + $0x30] sm:$0xff] %v1965_v41 }
 0x18a   : > { %v2110_v57 = vadd.s32 3, %v850_v39  ;;  %v1262_v33 = vmul.u32 %v1258_v21, %v3875_v49  ;;  %v1221_v59 = vsel %vm1217_vm10, %v1201_v8, %v1204_v63  ;;  %v1222_v18 = vsel %vm1220_vm9, %v1210_v35, 2102212464 }
 0x18b   : > { %v1239_v24 = vmul.u32 %v1237_v2, %v3868_v13  ;;  %v1240_v19 = vmul.u32 %v1236_v60, %v3875_v49  ;;  %v844_v3 = vmul.f32 %v843_v31, %v841_v34  ;;  %v1260_v61 = vmul.u32 %v1258_v21, %v3868_v13 }
 0x18c   : > { %v1263_v26 = vmul.u32 %v1259_v48, %v3875_v49  ;;  %v1264_v54 = vshll.u32 %v1261_v55, 16  ;;  %v1238_v30 = vmul.u32 %v1236_v60, %v3868_v13  ;;  %v1241_v1 = vmul.u32 %v1237_v2, %v3875_v49 }
 0x18d   : > { %v1242_v50 = vshll.u32 %v1239_v24, 16  ;;  %v1266_v43 = vshll.u32 %v1262_v33, 16  ;;  %v845_v63 = vxor.u32 2147483648, %v844_v3  ;;  %v1244_v12 = vshll.u32 %v1240_v19, 16 }
 0x18e   : > { %vm1268_vm12 = vc.u32 %v1260_v61, %v1264_v54  ;;  %v1270_v35 = vadd.s32 %v1264_v54, %v1260_v61  ;;  %vm1350_vm0 = vcmp.gt.s32.totalorder %v3879_v6, 0  ;;  %v1265_v52 = vshrl.u32 %v1261_v55, 16 }
 0x18f   : > { %vm1246_vm14 = vc.u32 %v1238_v30, %v1242_v50  ;;  %v1248_v20 = vadd.s32 %v1242_v50, %v1238_v30  ;;  %v1269_v40 = vsel %vm1268_vm12, 1, %v3013_v0  ;;  %v846_v51 = vsel %vm725_vm13, %v845_v63, %v844_v3 }
 0x190   : > { %v1247_v10 = vsel %vm1246_vm14, 1, %v3013_v0  ;;  %v1271_v13 = vadd.s32 %v1269_v40, %v1263_v26  ;;  %vm1272_vm1 = vc.u32 %v1270_v35, %v1266_v43  ;;  %v3978_v49 = vsel %vm3900_vm5, %v3579_v58, %v846_v51 }
 0x191   : > { %v1249_v29 = vadd.s32 %v1247_v10, %v1241_v1  ;;  %vm1250_vm2 = vc.u32 %v1248_v20, %v1244_v12  ;;  %v1273_v62 = vsel %vm1272_vm1, 1, %v3013_v0  ;;  %v851_v9 = vmul.f32 %v3978_v49, %v3978_v49 }
 0x192   : > { %v1251_v32 = vsel %vm1250_vm2, 1, %v3013_v0  ;;  %v1275_v45 = vadd.s32 %v1273_v62, %v1271_v13  ;;  %v1223_v21 = vsel %vm1219_vm8, %v3906_v47, %v1222_v18  ;;  %v1243_v48 = vshrl.u32 %v1239_v24, 16 }
 0x193   : > { %v1253_v17 = vadd.s32 %v1251_v32, %v1249_v29  ;;  %v1351_v38 = vsel %vm1350_vm0, %v3879_v6, 0  ;;  %v852_v36 = vmul.f32 -0.001358992, %v851_v9  ;;  %v859_v56 = vmul.f32 -0.00019511016, %v851_v9 }
 0x194   : > { %v1267_v25 = vshrl.u32 %v1262_v33, 16  ;;  %v1276_v28 = vadd.s32 %v1275_v45, %v1265_v52  ;;  %v3990_v8 = vand.u32 3, %v850_v39  ;;  %v1245_v42 = vshrl.u32 %v1240_v19, 16 }
 0x195   : > { %v1254_v41 = vadd.s32 %v1253_v17, %v1243_v48  ;;  %v1353_v60 = vand.u32 31, %v1351_v38  ;;  %v853_v2 = vadd.f32 0.041655596, %v852_v36  ;;  %v860_v55 = vadd.f32 0.008332121, %v859_v56 }
 0x196   : > { %v1224_v47 = vsel %vm1218_vm11, %v1221_v59, %v1223_v21  ;;  %v1277_v34 = vadd.s32 %v1276_v28, %v1267_v25  ;;  %v3994_v31 = vand.u32 3, %v2110_v57  ;;  %v3998_v6 = vadd.s32 %v1270_v35, %v1266_v43 }
 0x197   : > { %v3996_v18 = vadd.s32 %v1254_v41, %v1245_v42  ;;  %v4000_v24 = vsub.s32 32, %v1353_v60  ;;  %v854_v33 = vmul.f32 %v853_v2, %v851_v9  ;;  %v861_v39 = vmul.f32 %v860_v55, %v851_v9 }
 0x198   : > { %v1281_v3 = vadd.s32 1, %v1277_v34  ;;  %v1278_v19 = vmul.u32 %v3852_v46, %v1224_v47  ;;  %vm872_vm3 = vcmp.eq.s32.totalorder %v3990_v8, 2  ;;  %v4008_v59 = vshll.u32 %v1347_v37, 8 }
 0x199   : > { %vm1280_vm13 = vc.u32 %v3996_v18, %v3998_v6  ;;  %v855_v61 = vadd.f32 -0.4999988, %v854_v33  ;;  %v862_v53 = vadd.f32 -0.16666654, %v861_v39  ;;  %vm869_vm5 = vcmp.eq.s32.totalorder %v3990_v8, 0 }
 0x19a   : > { %v1282_v57 = vsel %vm1280_vm13, %v1281_v3, %v1277_v34  ;;  %vm2113_vm6 = vcmp.eq.s32.totalorder %v3994_v31, 0  ;;  %vm2116_vm4 = vcmp.eq.s32.totalorder %v3994_v31, 2  ;;  %v4013_v46 = vshrl.u32 %v1351_v38, 5 }
 0x19b   : > { %v1283_v26 = vadd.s32 %v1282_v57, %v1278_v19  ;;  %v1357_v54 = vshrl.u32 %v3017_v7, %v4000_v24  ;;  %v1360_v30 = vshrl.u32 %v3018_v11, %v4000_v24  ;;  %v856_v1 = vmul.f32 %v855_v61, %v851_v9 }
 0x19c   : > { %v863_v50 = vmul.f32 %v862_v53, %v851_v9  ;;  %vm868_vm15 = vcmp.lt.s32.totalorder %v3990_v8, 2  ;;  %vm2112_vm7 = vcmp.lt.s32.totalorder %v3994_v31, 2  ;;  %v1363_v22 = vshrl.u32 %v3019_v14, %v4000_v24 }
 0x19d   : > { %v1366_v37 = vshrl.u32 %v3020_v23, %v4000_v24  ;;  %vm866_vm10 = vweird.f32 %v3579_v58  ;;  %v1284_v43 = vadd.s32 536870912, %v1283_v26  ;;  %v1356_v63 = vshll.u32 %v3016_v5, %v1353_v60 }
 0x19e   : > { %v1359_v12 = vshll.u32 %v3017_v7, %v1353_v60  ;;  %v1365_v35 = vshll.u32 %v3019_v14, %v1353_v60  ;;  %v857_v20 = vadd.f32 1.0, %v856_v1  ;;  %v864_v40 = vadd.f32 1.0, %v863_v50 }
 0x19f   : > { %v1362_v51 = vshll.u32 %v3018_v11, %v1353_v60  ;;  %v1369_v10 = vshrl.u32 %v3021_v27, %v4000_v24  ;;  %v4032_v13 = vshrl.u32 %v1284_v43, 30  ;;  %v4034_v29 = vor.u32 %v1357_v54, %v1356_v63 }
 0x1a0   : > { %v4036_v62 = vor.u32 %v1360_v30, %v1359_v12  ;;  %v1367_v9 = vor.u32 %v1366_v37, %v1365_v35  ;;  %v865_v32 = vmul.f32 %v864_v40, %v3978_v49  ;;  %v873_v52 = vxor.u32 2147483648, %v857_v20 }
 0x1a1   : > { %v4039_v7 = vor.u32 %v1363_v22, %v1362_v51  ;;  %v1368_v14 = vshll.u32 %v3020_v23, %v1353_v60  ;;  %v1286_v45 = vshll.u32 %v4032_v13, 30  ;;  %vm1371_vm8 = vcmp.lt.s32.totalorder %v4013_v46, 1 }
 0x1a2   : > { %vm1372_vm9 = vcmp.lt.s32.totalorder %v4013_v46, 2  ;;  %v1388_v11 = vand.u32 65535, %v4008_v59  ;;  %v870_v27 = vxor.u32 2147483648, %v865_v32  ;;  %vm1373_vm11 = vcmp.lt.s32.totalorder %v4013_v46, 3 }
 0x1a3   : > { %v1370_v21 = vor.u32 %v1369_v10, %v1368_v14  ;;  %vm1374_vm12 = vcmp.lt.s32.totalorder %v4013_v46, 4  ;;  %v874_v49 = vsel %vm872_vm3, %v873_v52, %v865_v32  ;;  %v1287_v48 = vsub.s32 %v1283_v26, %v1286_v45 }
 0x1a4   : > { %v1379_v23 = vsel %vm1371_vm8, %v4034_v29, %v4036_v62  ;;  %v1380_v17 = vsel %vm1374_vm12, %v1367_v9, 920167782  ;;  %v871_v38 = vsel %vm869_vm5, %v857_v20, %v870_v27  ;;  %v2115_v36 = vsel %vm2113_vm6, %v857_v20, %v870_v27 }
 0x1a5   : > { %v2118_v56 = vsel %vm2116_vm4, %v873_v52, %v865_v32  ;;  %v1381_v25 = vsel %vm1373_vm11, %v4039_v7, %v1380_v17  ;;  %v875_v28 = vsel %vm868_vm15, %v871_v38, %v874_v49  ;;  %vm1288_vm14 = vcmp.lt.s32.totalorder %v1287_v48, 0 }
 0x1a6   : > { %v2119_v42 = vsel %vm2112_vm7, %v2115_v36, %v2118_v56  ;;  %v1289_v41 = vsub.s32 0, %v1287_v48  ;;  %v876_v60 = vsel %vm866_vm10, nan, %v875_v28  ;;  %v1382_v55 = vsel %vm1372_vm9, %v1379_v23, %v1381_v25 }
 0x1a7   : > { %v2120_v2 = vsel %vm866_vm10, nan, %v2119_v42  ;;  %v1383_v8 = vsel %vm1371_vm8, %v4036_v62, %v4039_v7  ;;  %1496 = vst [vmem:[%s3451_s30 + $0x28] sm:$0xff] %v876_v60  ;;  %v1384_v34 = vsel %vm1374_vm12, %v1370_v21, 1326507024  ;;  %v1412_v31 = vand.u32 65535, %v1382_v55 }
 0x1a8   : > { %v1290_v47 = vsel %vm1288_vm14, %v1289_v41, %v1287_v48  ;;  %v1413_v33 = vshrl.u32 %v1382_v55, 16  ;;  %2744 = vst [vmem:[%s3451_s30 + $0x38] sm:$0xff] %v2120_v2  ;;  %v1389_v58 = vshrl.u32 %v4008_v59, 16  ;;  %v1385_v3 = vsel %vm1373_vm11, %v1367_v9, %v1384_v34 }
 0x1a9   : > { %v1291_v39 = vclz %v1290_v47  ;;  %v1386_v53 = vsel %vm1372_vm9, %v1383_v8, %v1385_v3  ;;  %v1279_v30 = vadd.s32 %v3998_v6, %v3996_v18  ;;  %v1414_v43 = vmul.u32 %v1412_v31, %v1388_v11 }
 0x1aa   : > { %v1415_v19 = vmul.u32 %v1413_v33, %v1388_v11  ;;  %v1416_v57 = vmul.u32 %v1412_v31, %v1389_v58  ;;  %v1390_v26 = vand.u32 65535, %v1386_v53  ;;  %v1391_v54 = vshrl.u32 %v1386_v53, 16 }
 0x1ab   : > { %v2854_v61 = vadd.s32 4294967294, %v1291_v39  ;;  %v1417_v35 = vmul.u32 %v1413_v33, %v1389_v58  ;;  %v1355_v38 = vshrl.u32 %v3016_v5, %v4000_v24  ;;  %vm1187_vm5 = vcmp.lt.s32.totalorder %v3831_v15, 0 }
 0x1ac   : > { %v1418_v1 = vshll.u32 %v1415_v19, 16  ;;  %v1393_v22 = vmul.u32 %v1391_v54, %v1388_v11  ;;  %v1394_v37 = vmul.u32 %v1390_v26, %v1389_v58  ;;  %v1420_v20 = vshll.u32 %v1416_v57, 16 }
 0x1ad   : > { %vm2855_vm0 = vcmp.lt.s32.totalorder %v2854_v61, 0  ;;  %v1392_v51 = vmul.u32 %v1390_v26, %v1388_v11  ;;  %v1395_v10 = vmul.u32 %v1391_v54, %v1389_v58  ;;  %v1376_v11 = vsel %vm1374_vm12, %v4039_v7, 2102212464 }
 0x1ae   : > { %v1294_v50 = vsel %vm2855_vm0, 0, %v2854_v61  ;;  %v1396_v9 = vshll.u32 %v1393_v22, 16  ;;  %vm1422_vm1 = vc.u32 %v1414_v43, %v1418_v1  ;;  %v1424_v14 = vadd.s32 %v1418_v1, %v1414_v43 }
 0x1af   : > { %v1295_v63 = vsub.s32 32, %v1294_v50  ;;  %v1299_v12 = vsub.s32 4294967266, %v1294_v50  ;;  %v1296_v40 = vshll.u32 %v1287_v48, %v1294_v50  ;;  %v1398_v45 = vshll.u32 %v1394_v37, 16 }
 0x1b0   : > { %vm1400_vm2 = vc.u32 %v1392_v51, %v1396_v9  ;;  %v1402_v18 = vadd.s32 %v1396_v9, %v1392_v51  ;;  %v1423_v6 = vsel %vm1422_vm1, 1, %v3013_v0  ;;  %vm1426_vm3 = vc.u32 %v1424_v14, %v1420_v20 }
 0x1b1   : > { %v1297_v32 = vshrl.u32 %v1279_v30, %v1295_v63  ;;  %v1300_v52 = vadd.s32 127, %v1299_v12  ;;  %v1401_v49 = vsel %vm1400_vm2, 1, %v3013_v0  ;;  %v1425_v23 = vadd.s32 %v1423_v6, %v1417_v35 }
 0x1b2   : > { %v1403_v48 = vadd.s32 %v1401_v49, %v1395_v10  ;;  %vm1404_vm13 = vc.u32 %v1402_v18, %v1398_v45  ;;  %v1427_v56 = vsel %vm1426_vm3, 1, %v3013_v0  ;;  %v1397_v25 = vshrl.u32 %v1393_v22, 16 }
 0x1b3   : > { %v1298_v27 = vor.u32 %v1297_v32, %v1296_v40  ;;  %v1301_v21 = vshll.u32 %v1300_v52, 23  ;;  %v1405_v36 = vsel %vm1404_vm13, 1, %v3013_v0  ;;  %v1419_v42 = vshrl.u32 %v1415_v19, 16 }
 0x1b4   : > { %v1407_v28 = vadd.s32 %v1405_v36, %v1403_v48  ;;  %v1429_v41 = vadd.s32 %v1427_v56, %v1425_v23  ;;  %v1375_v7 = vsel %vm1371_vm8, %v1355_v38, %v4034_v29  ;;  %v1377_v55 = vsel %vm1373_vm11, %v4036_v62, %v1376_v11 }
 0x1b5   : > { %v1302_v17 = vor.u32 4788187, %v1301_v21  ;;  %v1305_v2 = vcvt.s32.f32 %v1298_v27  ;;  %v1399_v8 = vshrl.u32 %v1394_v37, 16  ;;  %v1421_v24 = vshrl.u32 %v1416_v57, 16 }
 0x1b6   : > { %v1408_v5 = vadd.s32 %v1407_v28, %v1397_v25  ;;  %v1430_v47 = vadd.s32 %v1429_v41, %v1419_v42  ;;  %v1378_v0 = vsel %vm1372_vm9, %v1375_v7, %v1377_v55  ;;  %v1428_v33 = vadd.s32 %v1424_v14, %v1420_v20 }
 0x1b7   : > { %v1303_v60 = vand.u32 2147483647, %v1302_v17  ;;  %vm4110_vm4 = vcmp.le.f32.partialorder %v1185_v16, 0.7853982  ;;  %v1432_v46 = vmul.u32 %v4008_v59, %v1378_v0  ;;  %v1309_v26 = vsub.s32 4, %v4032_v13 }
 0x1b8   : > { %v1409_v31 = vadd.s32 %v1408_v5, %v1399_v8  ;;  %v1431_v39 = vadd.s32 %v1430_v47, %v1421_v24  ;;  %vm1328_vm7 = vweird.f32 %v3831_v15  ;;  %vm1341_vm1 = vcmp.lt.s32.totalorder %v3840_v44, 0 }
 0x1b9   : > { %v1306_v34 = vmul.f32 %v1305_v2, %v1303_v60  ;;  %v1310_v59 = vsel %vm1187_vm5, %v1309_v26, %v4032_v13  ;;  %vm1340_vm2 = vcmp.le.f32.partialorder %v1339_v4, 0.7853982 }
 0x1ba   : > { %vm1434_vm6 = vc.u32 %v1409_v31, %v1428_v33  ;;  %v1435_v29 = vadd.s32 1, %v1431_v39  ;;  %v1312_v40 = vsel %vm4110_vm4, 0, %v1310_v59  ;;  %v1433_v36 = vadd.s32 %v1428_v33, %v1409_v31 }
 0x1bb   : > { %v1307_v58 = vxor.u32 2147483648, %v1306_v34  ;;  %v2575_v45 = vadd.s32 3, %v1312_v40  ;;  %v1329_v18 = vand.u32 3, %v1312_v40 }
 0x1bc   : > { %v1436_v61 = vsel %vm1434_vm6, %v1435_v29, %v1431_v39 }
 0x1bd   : > { %v1308_v3 = vsel %vm1187_vm5, %v1307_v58, %v1306_v34  ;;  %v1437_v57 = vadd.s32 %v1436_v61, %v1432_v46  ;;  %v2576_v23 = vand.u32 3, %v2575_v45  ;;  %vm1331_vm10 = vcmp.eq.s32.totalorder %v1329_v18, 0 }
 0x1be   : > { %v1311_v19 = vsel %vm4110_vm4, %v3831_v15, %v1308_v3  ;;  %vm1334_vm8 = vcmp.eq.s32.totalorder %v1329_v18, 2  ;;  %vm1330_vm11 = vcmp.lt.s32.totalorder %v1329_v18, 2 }
 0x1bf   : > { %v1313_v53 = vmul.f32 %v1311_v19, %v1311_v19  ;;  %v1438_v16 = vadd.s32 536870912, %v1437_v57  ;;  %vm2578_vm12 = vcmp.eq.s32.totalorder %v2576_v23, 0  ;;  %vm2581_vm14 = vcmp.eq.s32.totalorder %v2576_v23, 2 }
 0x1c0   : > { %vm2577_vm0 = vcmp.lt.s32.totalorder %v2576_v23, 2 }
 0x1c1   : > { %v1314_v54 = vmul.f32 -0.001358992, %v1313_v53  ;;  %v1321_v30 = vmul.f32 -0.00019511016, %v1313_v53  ;;  %v4121_v22 = vshrl.u32 %v1438_v16, 30 }
 0x1c3   : > { %v1315_v1 = vadd.f32 0.041655596, %v1314_v54  ;;  %v1322_v50 = vadd.f32 0.008332121, %v1321_v30  ;;  %v1440_v63 = vshll.u32 %v4121_v22, 30  ;;  %v1463_v58 = vsub.s32 4, %v4121_v22 }
 0x1c5   : > { %v1316_v37 = vmul.f32 %v1315_v1, %v1313_v53  ;;  %v1323_v43 = vmul.f32 %v1322_v50, %v1313_v53  ;;  %v1441_v20 = vsub.s32 %v1437_v57, %v1440_v63  ;;  %v1464_v46 = vsel %vm1341_vm1, %v1463_v58, %v4121_v22 }
 0x1c7   : > { %v1317_v12 = vadd.f32 -0.4999988, %v1316_v37  ;;  %v1324_v35 = vadd.f32 -0.16666654, %v1323_v43  ;;  %vm1442_vm15 = vcmp.lt.s32.totalorder %v1441_v20, 0  ;;  %v1443_v9 = vsub.s32 0, %v1441_v20 }
 0x1c9   : > { %v1318_v51 = vmul.f32 %v1317_v12, %v1313_v53  ;;  %v1325_v10 = vmul.f32 %v1324_v35, %v1313_v53  ;;  %v1444_v14 = vsel %vm1442_vm15, %v1443_v9, %v1441_v20  ;;  %v1466_v53 = vsel %vm1340_vm2, 0, %v1464_v46 }
 0x1ca   : > { %v1445_v13 = vclz %v1444_v14  ;;  %v2730_v4 = vadd.s32 3, %v1466_v53  ;;  %v1483_v37 = vand.u32 3, %v1466_v53 }
 0x1cb   : > { %v1319_v32 = vadd.f32 1.0, %v1318_v51  ;;  %v1326_v52 = vadd.f32 1.0, %v1325_v10 }
 0x1cc   : > { %v2857_v21 = vadd.s32 4294967294, %v1445_v13  ;;  %v2731_v43 = vand.u32 3, %v2730_v4  ;;  %vm1484_vm13 = vcmp.lt.s32.totalorder %v1483_v37, 2  ;;  %vm1485_vm3 = vcmp.eq.s32.totalorder %v1483_v37, 0 }
 0x1cd   : > { %v1327_v6 = vmul.f32 %v1326_v52, %v1311_v19  ;;  %v1335_v27 = vxor.u32 2147483648, %v1319_v32  ;;  %vm1488_vm5 = vcmp.eq.s32.totalorder %v1483_v37, 2 }
 0x1ce   : > { %vm2858_vm9 = vcmp.lt.s32.totalorder %v2857_v21, 0  ;;  %vm2732_vm6 = vcmp.lt.s32.totalorder %v2731_v43, 2  ;;  %vm2733_vm4 = vcmp.eq.s32.totalorder %v2731_v43, 0  ;;  %vm2736_vm15 = vcmp.eq.s32.totalorder %v2731_v43, 2 }
 0x1cf   : > { %v1332_v49 = vxor.u32 2147483648, %v1327_v6  ;;  %v1336_v48 = vsel %vm1334_vm8, %v1335_v27, %v1327_v6  ;;  %v1448_v17 = vsel %vm2858_vm9, 0, %v2857_v21  ;;  %v2583_v7 = vsel %vm2581_vm14, %v1335_v27, %v1327_v6 }
 0x1d0   : > { %v1449_v56 = vsub.s32 32, %v1448_v17  ;;  %v1453_v25 = vsub.s32 4294967266, %v1448_v17  ;;  %v1450_v42 = vshll.u32 %v1441_v20, %v1448_v17 }
 0x1d1   : > { %v1333_v11 = vsel %vm1331_vm10, %v1319_v32, %v1332_v49  ;;  %v2580_v2 = vsel %vm2578_vm12, %v1319_v32, %v1332_v49 }
 0x1d2   : > { %v1337_v38 = vsel %vm1330_vm11, %v1333_v11, %v1336_v48  ;;  %v1451_v41 = vshrl.u32 %v1433_v36, %v1449_v56  ;;  %v1454_v60 = vadd.s32 127, %v1453_v25  ;;  %v2584_v5 = vsel %vm2577_vm0, %v2580_v2, %v2583_v7 }
 0x1d3   : > { %v1338_v28 = vsel %vm1328_vm7, nan, %v1337_v38  ;;  %v2585_v24 = vsel %vm1328_vm7, nan, %v2584_v5  ;;  %vm1482_vm7 = vweird.f32 %v3840_v44 }
 0x1d4   : > { %1499 = vst [vmem:[%s3451_s30 + $0x60] sm:$0xff] %v1338_v28  ;;  %v1452_v55 = vor.u32 %v1451_v41, %v1450_v42  ;;  %v1455_v8 = vshll.u32 %v1454_v60, 23 }
 0x1d5   : > { %2747 = vst [vmem:[%s3451_s30 + $0x70] sm:$0xff] %v2585_v24 }
 0x1d6   : > { %v1456_v47 = vor.u32 4788187, %v1455_v8  ;;  %v1459_v0 = vcvt.s32.f32 %v1452_v55 }
 0x1d8   : > { %v1457_v34 = vand.u32 2147483647, %v1456_v47 }
 0x1da   : > { %v1460_v31 = vmul.f32 %v1459_v0, %v1457_v34 }
 0x1dc   : > { %v1461_v33 = vxor.u32 2147483648, %v1460_v31 }
 0x1de   : > { %v1462_v39 = vsel %vm1341_vm1, %v1461_v33, %v1460_v31 }
 0x1df   : > { %v1465_v29 = vsel %vm1340_vm2, %v3840_v44, %v1462_v39 }
 0x1e0   : > { %v1467_v62 = vmul.f32 %v1465_v29, %v1465_v29 }
 0x1e2   : > { %v1468_v15 = vmul.f32 -0.001358992, %v1467_v62  ;;  %v1475_v3 = vmul.f32 -0.00019511016, %v1467_v62 }
 0x1e4   : > { %v1469_v19 = vadd.f32 0.041655596, %v1468_v15  ;;  %v1476_v61 = vadd.f32 0.008332121, %v1475_v3 }
 0x1e6   : > { %v1470_v57 = vmul.f32 %v1469_v19, %v1467_v62  ;;  %v1477_v26 = vmul.f32 %v1476_v61, %v1467_v62 }
 0x1e8   : > { %v1471_v54 = vadd.f32 -0.4999988, %v1470_v57  ;;  %v1478_v30 = vadd.f32 -0.16666654, %v1477_v26 }
 0x1ea   : > { %v1472_v16 = vmul.f32 %v1471_v54, %v1467_v62  ;;  %v1479_v1 = vmul.f32 %v1478_v30, %v1467_v62 }
 0x1ec   : > { %v1473_v50 = vadd.f32 1.0, %v1472_v16  ;;  %v1480_v59 = vadd.f32 1.0, %v1479_v1 }
 0x1ee   : > { %v1481_v22 = vmul.f32 %v1480_v59, %v1465_v29  ;;  %v1489_v63 = vxor.u32 2147483648, %v1473_v50 }
 0x1f0   : > { %v1486_v12 = vxor.u32 2147483648, %v1481_v22  ;;  %v1490_v20 = vsel %vm1488_vm5, %v1489_v63, %v1481_v22  ;;  %v2738_v51 = vsel %vm2736_vm15, %v1489_v63, %v1481_v22 }
 0x1f2   : > { %v1487_v35 = vsel %vm1485_vm3, %v1473_v50, %v1486_v12  ;;  %v2735_v40 = vsel %vm2733_vm4, %v1473_v50, %v1486_v12 }
 0x1f3   : > { %v1491_v10 = vsel %vm1484_vm13, %v1487_v35, %v1490_v20  ;;  %v2739_v9 = vsel %vm2732_vm6, %v2735_v40, %v2738_v51 }
 0x1f4   : > { %v1492_v32 = vsel %vm1482_vm7, nan, %v1491_v10  ;;  %v2740_v52 = vsel %vm1482_vm7, nan, %v2739_v9 }
 0x1f5   : > { %1500 = vst [vmem:[%s3451_s30 + $0x68] sm:$0xff] %v1492_v32 }
 0x1f6   : > { %2748 = vst [vmem:[%s3451_s30 + $0x78] sm:$0xff] %v2740_v52 }
 0x1f7   : > { %2976 = shalt.err (!%p2973_p3)
}
 0x1f8   : > { %s3022_s25 = smov 512   ;;  %s3023_s26 = smov 32  }
 0x1f9   : > { %2891 = dma.vmem_to_hbm [thread:$0]  (%p3077_p5), %s2764_s7, 2048, %s2766_s8, %s2750_s13, %s3022_s25, %s3022_s25, %s3023_s26  }
 0x1fa PF: > { %p2897_p4 = scmp.ge.s32.totalorder %s3011_s12, 2  ;;  %s2780_s27 = sand.u32 1, %s2999_s9  }
 0x1fb   : > { %s2781_s28 = scalar_lea.sflag [#allocation3], %s2780_s27 }
 0x1fc   : > { %p2894_p7 = pnand %p2897_p4, %p3081_p6 }
 0x1fe   : > { %p2895_p8 = pneg %p2894_p7 }
 0x200   : > { %2994 = dma.done.wait (%p2895_p8), %s2781_s28, 2048  }
 0x201   : > { %2996 = vsyncadd (%p2895_p8), %s2781_s28, 4294965248  ;;  %p12_p9 = scmp.ge.s32.totalorder %s3064_s15, 4   ;;  %s4198_s9 = smov %s3003_s10 }
 0x202   : > { %s4199_s10 = smov %s3007_s11  ;;  %s4200_s11 = smov %s3075_s18 }
 0x203   : > { %s4201_s12 = smov %s3064_s15  ;;  %14 = sbr.rel (!%p12_p9) target bundleno = 3 (0x3), region = 63 }
 0x208   :  { %2787 = vsyncpa [#allocation3], 1 }
 0x209   :  { %2789 = vsyncpa [#allocation3 + $0x1], 1 }

</bundles_post_ra>
